<compile_context>
chip_gen: v5e
topology: v5e:2x2
jax: 0.10.0
libtpu: 0.0.40
codegen_flags: <defaults>
</compile_context>

<pallas_src>
import functools

import jax
import jax.numpy as jnp
from jax.experimental import pallas as pl
from jax.experimental.pallas import tpu as pltpu  # noqa: F401


def _full_spec(shape):
    # Whole-array block (everything is tiny; block == full array satisfies the
    # (8,128) tiling rule).  No grid -> index_map takes no args.
    return pl.BlockSpec(shape, lambda *_: (0,) * len(shape))


# --------------------------- fused InputModule kernel ---------------------------

def _input_module_kernel(x_ref, mem_ref, ids_ref,
                         lstm_w_ref, lstm_b_ref,
                         gi_table_ref, gru_whh_ref,
                         emb_out_ref, mem_out_ref,
                         *, t_steps, bp):
    B, H = x_ref.shape
    Hc = gru_whh_ref.shape[0]

    # ---- LSTMCell: single fused gate matmul on [x | h0] (bf16 in, f32 acc) ----
    x = x_ref[...]
    mem = mem_ref[...]                      # read fully before aliased write
    h0 = mem[:, :H]
    c0 = mem[:, H:]
    xh = jnp.concatenate([x, h0], axis=1).astype(jnp.bfloat16)   # (B, 2H)
    gates = (jnp.dot(xh, lstm_w_ref[...],
                     preferred_element_type=jnp.float32)
             + lstm_b_ref[...])                                  # (B, 4H) f32
    i_g = jax.nn.sigmoid(gates[:, 0 * H:1 * H])
    f_g = jax.nn.sigmoid(gates[:, 1 * H:2 * H])
    g_g = jnp.tanh(gates[:, 2 * H:3 * H])
    o_g = jax.nn.sigmoid(gates[:, 3 * H:4 * H])
    c_new = f_g * c0 + i_g * g_g
    h_new = o_g * jnp.tanh(c_new)
    # Single consolidated store for the memory output.
    mem_out_ref[...] = jnp.concatenate([h_new, c_new], axis=1)

    # ---- text path: fused (embedding @ W_ih + b_ih) table lookup + GRU ----
    ids = ids_ref[...]                                           # (T*Bp, 1) int32, time-major, padded
    TBp = ids.shape[0]
    vocab = gi_table_ref.shape[0]
    onehot = (ids == jax.lax.broadcasted_iota(jnp.int32, (TBp, vocab), 1)
              ).astype(jnp.bfloat16)                             # exact 0/1 in bf16
    # Single matmul == exact row lookup of the (bf16) fused table; f32 result.
    gi_all = jnp.dot(onehot, gi_table_ref[...],
                     preferred_element_type=jnp.float32)         # (T*Bp, 3Hc)

    whh = gru_whh_ref[...]                                       # (Hc, 3Hc) bf16

    # Step 0 peeled: h == 0 and b_hh == 0  =>  gh == 0, r unused.
    gi0 = gi_all[0:bp, :]
    z = jax.nn.sigmoid(gi0[:, 1 * Hc:2 * Hc])
    n = jnp.tanh(gi0[:, 2 * Hc:3 * Hc])
    h = (1.0 - z) * n                                            # (Bp, Hc) f32

    # Remaining steps: static unroll; whh is loop-invariant (stays resident).
    # NOTE: b_hh is zero by construction; if it ever becomes nonzero, fold its
    # r/z components into the table and add only the n component inside r*(...).
    for t in range(1, t_steps):
        gi = gi_all[t * bp:(t + 1) * bp, :]                      # tile-aligned slice
        gh = jnp.dot(h.astype(jnp.bfloat16), whh,
                     preferred_element_type=jnp.float32)         # (Bp, 3Hc)
        r = jax.nn.sigmoid(gi[:, 0 * Hc:1 * Hc] + gh[:, 0 * Hc:1 * Hc])
        z = jax.nn.sigmoid(gi[:, 1 * Hc:2 * Hc] + gh[:, 1 * Hc:2 * Hc])
        n = jnp.tanh(gi[:, 2 * Hc:3 * Hc] + r * gh[:, 2 * Hc:3 * Hc])
        h = (1.0 - z) * n + z * h

    # Single consolidated store for the embedding output (padding rows dropped).
    emb_out_ref[...] = jnp.concatenate([h_new, h[:B, :]], axis=1)


def input_module_forward(x, memory, ids_flat, lstm_w, lstm_b, gi_table, gru_whh,
                         *, t_steps, bp):
    B, H = x.shape
    TBp = ids_flat.shape[0]
    assert TBp == t_steps * bp
    vocab, _ = gi_table.shape
    Hc = gru_whh.shape[0]
    kernel = functools.partial(_input_module_kernel, t_steps=t_steps, bp=bp)
    return pl.pallas_call(
        kernel,
        out_shape=(jax.ShapeDtypeStruct((B, H + Hc), jnp.float32),
                   jax.ShapeDtypeStruct((B, 2 * H), jnp.float32)),
        in_specs=[_full_spec((B, H)), _full_spec((B, 2 * H)),
                  _full_spec((TBp, 1)),
                  _full_spec((2 * H, 4 * H)), _full_spec((1, 4 * H)),
                  _full_spec((vocab, 3 * Hc)), _full_spec((Hc, 3 * Hc))],
        out_specs=(_full_spec((B, H + Hc)), _full_spec((B, 2 * H))),
        # memory-out aliases memory-in (true in-place update when the caller
        # donates `memory`; otherwise XLA inserts a tiny copy).
        input_output_aliases={1: 1},
    )(x, memory, ids_flat, lstm_w, lstm_b, gi_table, gru_whh)


# ------------------------------ InputModule ----------------------------------

class InputModuleJAX:
    def __init__(self, key, vocab_size, input_embedding_size,
                 use_text=True, use_memory=True):
        self.use_text = use_text
        self.use_memory = use_memory
        self.H = input_embedding_size
        self.semi_memory_size = input_embedding_size
        keys = jax.random.split(key, 8)

        def u(k, shape, fan):
            bound = 1.0 / jnp.sqrt(fan)
            return jax.random.uniform(k, shape, jnp.float32, -bound, bound)

        if use_memory:
            H = self.H
            # f32 "master" parameters (reference / fallback path).
            self.lstm_w_ih = u(keys[0], (4 * H, H), H)
            self.lstm_w_hh = u(keys[1], (4 * H, H), H)
            self.lstm_b_ih = u(keys[2], (4 * H,), H)
            self.lstm_b_hh = u(keys[3], (4 * H,), H)
            # Kernel packing: one (2H, 4H) bf16 slab + summed f32 bias row.
            self.lstm_w_packed = jnp.concatenate(
                [self.lstm_w_ih.T, self.lstm_w_hh.T], axis=0).astype(jnp.bfloat16)
            self.lstm_b_packed = (self.lstm_b_ih + self.lstm_b_hh).reshape(1, 4 * H)
        if use_text:
            self.word_embedding_size = 32
            self.text_embedding_size = 128
            W, Hc = self.word_embedding_size, self.text_embedding_size
            self.word_embedding = jax.random.normal(
                keys[4], (vocab_size, W), jnp.float32)
            self.gru_w_ih = u(keys[5], (3 * Hc, W), Hc)
            self.gru_w_hh = u(keys[6], (3 * Hc, Hc), Hc)
            self.gru_b_ih = u(keys[7], (3 * Hc,), Hc)
            self.gru_b_hh = jnp.zeros((3 * Hc,), jnp.float32)    # kept at zero (kernel relies on it)
            # Fused lookup table: embedding @ W_ih^T + b_ih, one bf16 slab.
            self.gi_table = (self.word_embedding @ self.gru_w_ih.T
                             + self.gru_b_ih).astype(jnp.bfloat16)   # (vocab, 3Hc)
            self.gru_whh_bf16 = self.gru_w_hh.T.astype(jnp.bfloat16)  # (Hc, 3Hc)
            self.gru_wih_t = self.gru_w_ih.T                     # (W, 3Hc)   (fallback path)
            self.gru_whh_t = self.gru_w_hh.T                     # (Hc, 3Hc)  (fallback path)
            self.gru_bih_row = self.gru_b_ih.reshape(1, 3 * Hc)
            self.gru_bhh_row = self.gru_b_hh.reshape(1, 3 * Hc)

        self.embedding_size = self.H + (self.text_embedding_size if use_text else 0)

    @functools.partial(jax.jit, static_argnums=0)
    def forward(self, text_ids, x, memory):
        if self.use_memory and self.use_text:
            B, T = text_ids.shape
            # Time-major layout, padded so each step occupies a full sublane tile.
            Bp = ((B + 7) // 8) * 8
            ids_tm = text_ids.T.astype(jnp.int32)                          # (T, B)
            ids_pad = jnp.zeros((T, Bp), jnp.int32).at[:, :B].set(ids_tm)  # (T, Bp)
            ids_flat = ids_pad.reshape(T * Bp, 1)
            embedding, memory_out = input_module_forward(
                x, memory, ids_flat,
                self.lstm_w_packed, self.lstm_b_packed,
                self.gi_table, self.gru_whh_bf16,
                t_steps=T, bp=Bp)
            return embedding, memory_out

        # TODO(synk): non-default flag combos fall back to plain JAX (not the optimized path).
        H = self.H
        if self.use_memory:
            h0, c0 = memory[:, :H], memory[:, H:]
            gates = (x @ self.lstm_w_ih.T + h0 @ self.lstm_w_hh.T
                     + self.lstm_b_ih + self.lstm_b_hh)
            i = jax.nn.sigmoid(gates[:, :H]); f = jax.nn.sigmoid(gates[:, H:2 * H])
            g = jnp.tanh(gates[:, 2 * H:3 * H]); o = jax.nn.sigmoid(gates[:, 3 * H:])
            c = f * c0 + i * g
            h = o * jnp.tanh(c)
            embedding, memory = h, jnp.concatenate([h, c], 1)
        else:
            embedding = x
        if self.use_text:
            Hc = self.text_embedding_size
            emb = jnp.take(self.word_embedding, text_ids, axis=0)
            ht = jnp.zeros((x.shape[0], Hc), jnp.float32)
            for t in range(emb.shape[1]):
                gi = emb[:, t, :] @ self.gru_wih_t + self.gru_bih_row
                gh = ht @ self.gru_whh_t + self.gru_bhh_row
                r = jax.nn.sigmoid(gi[:, :Hc] + gh[:, :Hc])
                z = jax.nn.sigmoid(gi[:, Hc:2 * Hc] + gh[:, Hc:2 * Hc])
                n = jnp.tanh(gi[:, 2 * Hc:] + r * gh[:, 2 * Hc:])
                ht = (1.0 - z) * n + z * ht
            embedding = jnp.concatenate([embedding, ht], axis=1)
        return embedding, memory


# ---------------------------- pure-JAX references -----------------------------

def _reference_f32(mod, text_ids, x, memory):
    """Original-semantics reference: full f32 weights and math."""
    H = mod.H
    h0, c0 = memory[:, :H], memory[:, H:]
    gates = x @ mod.lstm_w_ih.T + h0 @ mod.lstm_w_hh.T + mod.lstm_b_ih + mod.lstm_b_hh
    i = jax.nn.sigmoid(gates[:, :H]); f = jax.nn.sigmoid(gates[:, H:2 * H])
    g = jnp.tanh(gates[:, 2 * H:3 * H]); o = jax.nn.sigmoid(gates[:, 3 * H:])
    c = f * c0 + i * g
    h = o * jnp.tanh(c)
    Hc = mod.text_embedding_size
    emb = jnp.take(mod.word_embedding, text_ids, axis=0)
    ht = jnp.zeros((x.shape[0], Hc), jnp.float32)
    for t in range(emb.shape[1]):
        gi = emb[:, t, :] @ mod.gru_w_ih.T + mod.gru_b_ih
        gh = ht @ mod.gru_w_hh.T + mod.gru_b_hh
        r = jax.nn.sigmoid(gi[:, :Hc] + gh[:, :Hc])
        z = jax.nn.sigmoid(gi[:, Hc:2 * Hc] + gh[:, Hc:2 * Hc])
        n = jnp.tanh(gi[:, 2 * Hc:] + r * gh[:, 2 * Hc:])
        ht = (1.0 - z) * n + z * ht
    return jnp.concatenate([h, ht], axis=1), jnp.concatenate([h, c], axis=1)


def _reference_quantized(mod, text_ids, x, memory):
    """Kernel-implementation reference: same bf16-quantized params, f32 math."""
    H = mod.H
    Hc = mod.text_embedding_size
    w = mod.lstm_w_packed.astype(jnp.float32)
    gates = jnp.concatenate([x, memory[:, :H]], 1) @ w + mod.lstm_b_packed
    i = jax.nn.sigmoid(gates[:, :H]); f = jax.nn.sigmoid(gates[:, H:2 * H])
    g = jnp.tanh(gates[:, 2 * H:3 * H]); o = jax.nn.sigmoid(gates[:, 3 * H:])
    c = f * memory[:, H:] + i * g
    h = o * jnp.tanh(c)
    table = mod.gi_table.astype(jnp.float32)
    whh = mod.gru_whh_bf16.astype(jnp.float32)
    ht = jnp.zeros((x.shape[0], Hc), jnp.float32)
    for t in range(text_ids.shape[1]):
        gi = jnp.take(table, text_ids[:, t], axis=0)
        gh = ht @ whh
        r = jax.nn.sigmoid(gi[:, :Hc] + gh[:, :Hc])
        z = jax.nn.sigmoid(gi[:, Hc:2 * Hc] + gh[:, Hc:2 * Hc])
        n = jnp.tanh(gi[:, 2 * Hc:] + r * gh[:, 2 * Hc:])
        ht = (1.0 - z) * n + z * ht
    return jnp.concatenate([h, ht], axis=1), jnp.concatenate([h, c], axis=1)


if __name__ == "__main__":
    key = jax.random.PRNGKey(0)
    k_mod, k_x, k_mem, k_txt = jax.random.split(key, 4)

    B = 2
    H = 32          # input_embedding_size
    T = 8           # text sequence length
    VOCAB = 16      # obs_space['text']

    mod = InputModuleJAX(k_mod, vocab_size=VOCAB, input_embedding_size=H,
                         use_text=True, use_memory=True)

    x = jax.random.normal(k_x, (B, H), jnp.float32)
    memory = jax.random.normal(k_mem, (B, 2 * H), jnp.float32)
    text_ids = jax.random.randint(k_txt, (B, T), 0, VOCAB, jnp.int32)

    embedding, memory_out = mod.forward(text_ids, x, memory)
    jax.block_until_ready((embedding, memory_out))

    assert embedding.shape == (B, H + 128)
    assert memory_out.shape == (B, 2 * H)

    # Kernel-implementation check: same bf16-quantized parameters, f32 math.
    refq_emb, refq_mem = _reference_quantized(mod, text_ids, x, memory)
    assert jnp.allclose(embedding, refq_emb, rtol=2e-2, atol=2e-2)
    assert jnp.allclose(memory_out, refq_mem, rtol=2e-2, atol=2e-2)

    # End-to-end semantics check vs. the original f32 module (tolerance relaxed
    # for the bf16 weight quantization adopted per the performance review).
    ref_emb, ref_mem = _reference_f32(mod, text_ids, x, memory)
    assert jnp.allclose(embedding, ref_emb, rtol=5e-2, atol=5e-2)
    assert jnp.allclose(memory_out, ref_mem, rtol=5e-2, atol=5e-2)

    print("KERNEL_OK")
</pallas_src>

<mosaic_0001>
module attributes {stable_mosaic.version = 11 : i64} {
  func.func @_input_module_kernel(%arg0: memref<2x32xf32, #tpu.memory_space<vmem>>, %arg1: memref<2x64xf32, #tpu.memory_space<vmem>>, %arg2: memref<64x1xi32, #tpu.memory_space<vmem>>, %arg3: memref<64x128xbf16, #tpu.memory_space<vmem>>, %arg4: memref<1x128xf32, #tpu.memory_space<vmem>>, %arg5: memref<16x384xbf16, #tpu.memory_space<vmem>>, %arg6: memref<128x384xbf16, #tpu.memory_space<vmem>>, %arg7: memref<2x160xf32, #tpu.memory_space<vmem>>, %arg8: memref<2x64xf32, #tpu.memory_space<vmem>>) attributes {dimension_semantics = [], scalar_prefetch = 0 : i64, scratch_operands = 0 : i64, tpu.core_type = #tpu.core_type<tc>} {
    %c0 = arith.constant 0 : index
    %c0_0 = arith.constant 0 : index
    %0 = vector.load %arg0[%c0, %c0_0] : memref<2x32xf32, #tpu.memory_space<vmem>>, vector<2x32xf32>
    %c0_1 = arith.constant 0 : index
    %c0_2 = arith.constant 0 : index
    %1 = vector.load %arg1[%c0_1, %c0_2] : memref<2x64xf32, #tpu.memory_space<vmem>>, vector<2x64xf32>
    %2 = vector.extract_strided_slice %1 {offsets = [0, 0], sizes = [2, 32], strides = [1, 1]} : vector<2x64xf32> to vector<2x32xf32>
    %3 = vector.extract_strided_slice %1 {offsets = [0, 32], sizes = [2, 32], strides = [1, 1]} : vector<2x64xf32> to vector<2x32xf32>
    %4 = tpu.concatenate %0, %2 in 1 : vector<2x32xf32>, vector<2x32xf32> -> vector<2x64xf32>
    %5 = arith.truncf %4 : vector<2x64xf32> to vector<2x64xbf16>
    %c0_3 = arith.constant 0 : index
    %c0_4 = arith.constant 0 : index
    %6 = vector.load %arg3[%c0_3, %c0_4] : memref<64x128xbf16, #tpu.memory_space<vmem>>, vector<64x128xbf16>
    %cst = arith.constant dense<0.000000e+00> : vector<2x128xf32>
    %7 = tpu.matmul %5, %6, %cst {dimension_numbers = #tpu.dot_dimension_numbers<[1], [0], [0], [1], [0, 0, 1, 1], [], []>} : vector<2x64xbf16>, vector<64x128xbf16>, vector<2x128xf32> -> vector<2x128xf32>
    %c0_5 = arith.constant 0 : index
    %c0_6 = arith.constant 0 : index
    %8 = vector.load %arg4[%c0_5, %c0_6] : memref<1x128xf32, #tpu.memory_space<vmem>>, vector<1x128xf32>
    %9 = vector.broadcast %8 : vector<1x128xf32> to vector<2x128xf32>
    %10 = arith.addf %7, %9 : vector<2x128xf32>
    %11 = vector.extract_strided_slice %10 {offsets = [0, 0], sizes = [2, 32], strides = [1, 1]} : vector<2x128xf32> to vector<2x32xf32>
    %12 = arith.negf %11 : vector<2x32xf32>
    %13 = math.exp %12 : vector<2x32xf32>
    %cst_7 = arith.constant 1.000000e+00 : f32
    %14 = vector.broadcast %cst_7 : f32 to vector<2x32xf32>
    %15 = arith.addf %14, %13 : vector<2x32xf32>
    %16 = arith.divf %14, %15 : vector<2x32xf32>
    %17 = vector.extract_strided_slice %10 {offsets = [0, 32], sizes = [2, 32], strides = [1, 1]} : vector<2x128xf32> to vector<2x32xf32>
    %18 = arith.negf %17 : vector<2x32xf32>
    %19 = math.exp %18 : vector<2x32xf32>
    %cst_8 = arith.constant 1.000000e+00 : f32
    %20 = vector.broadcast %cst_8 : f32 to vector<2x32xf32>
    %21 = arith.addf %20, %19 : vector<2x32xf32>
    %22 = arith.divf %20, %21 : vector<2x32xf32>
    %23 = vector.extract_strided_slice %10 {offsets = [0, 64], sizes = [2, 32], strides = [1, 1]} : vector<2x128xf32> to vector<2x32xf32>
    %24 = math.tanh %23 : vector<2x32xf32>
    %25 = vector.extract_strided_slice %10 {offsets = [0, 96], sizes = [2, 32], strides = [1, 1]} : vector<2x128xf32> to vector<2x32xf32>
    %26 = arith.negf %25 : vector<2x32xf32>
    %27 = math.exp %26 : vector<2x32xf32>
    %cst_9 = arith.constant 1.000000e+00 : f32
    %28 = vector.broadcast %cst_9 : f32 to vector<2x32xf32>
    %29 = arith.addf %28, %27 : vector<2x32xf32>
    %30 = arith.divf %28, %29 : vector<2x32xf32>
    %31 = arith.mulf %22, %3 : vector<2x32xf32>
    %32 = arith.mulf %16, %24 : vector<2x32xf32>
    %33 = arith.addf %31, %32 : vector<2x32xf32>
    %34 = math.tanh %33 : vector<2x32xf32>
    %35 = arith.mulf %30, %34 : vector<2x32xf32>
    %36 = tpu.concatenate %35, %33 in 1 : vector<2x32xf32>, vector<2x32xf32> -> vector<2x64xf32>
    %c0_10 = arith.constant 0 : index
    %c0_11 = arith.constant 0 : index
    %37 = vector.load %arg8[%c0_10, %c0_11] : memref<2x64xf32, #tpu.memory_space<vmem>>, vector<2x64xf32>
    tpu.vector_store %arg8[%c0_10, %c0_11], %36 {strides = array<i32>} : memref<2x64xf32, #tpu.memory_space<vmem>>, vector<2x64xf32>,
    %c0_12 = arith.constant 0 : index
    %c0_13 = arith.constant 0 : index
    %38 = vector.load %arg2[%c0_12, %c0_13] : memref<64x1xi32, #tpu.memory_space<vmem>>, vector<64x1xi32>
    %39 = tpu.iota {dimensions = array<i32: 1>} : vector<64x16xi32>
    %40 = vector.broadcast %38 : vector<64x1xi32> to vector<64x16xi32>
    %41 = arith.cmpi eq, %40, %39 : vector<64x16xi32>
    %42 = arith.extui %41 : vector<64x16xi1> to vector<64x16xi32>
    %43 = arith.sitofp %42 : vector<64x16xi32> to vector<64x16xf32>
    %44 = arith.truncf %43 : vector<64x16xf32> to vector<64x16xbf16>
    %c0_14 = arith.constant 0 : index
    %c0_15 = arith.constant 0 : index
    %45 = vector.load %arg5[%c0_14, %c0_15] : memref<16x384xbf16, #tpu.memory_space<vmem>>, vector<16x384xbf16>
    %cst_16 = arith.constant dense<0.000000e+00> : vector<64x384xf32>
    %46 = tpu.matmul %44, %45, %cst_16 {dimension_numbers = #tpu.dot_dimension_numbers<[1], [0], [0], [1], [0, 0, 1, 1], [], []>} : vector<64x16xbf16>, vector<16x384xbf16>, vector<64x384xf32> -> vector<64x384xf32>
    %c0_17 = arith.constant 0 : index
    %c0_18 = arith.constant 0 : index
    %47 = vector.load %arg6[%c0_17, %c0_18] : memref<128x384xbf16, #tpu.memory_space<vmem>>, vector<128x384xbf16>
    %48 = vector.extract_strided_slice %46 {offsets = [0, 0], sizes = [8, 384], strides = [1, 1]} : vector<64x384xf32> to vector<8x384xf32>
    %49 = vector.extract_strided_slice %48 {offsets = [0, 128], sizes = [8, 128], strides = [1, 1]} : vector<8x384xf32> to vector<8x128xf32>
    %50 = arith.negf %49 : vector<8x128xf32>
    %51 = math.exp %50 : vector<8x128xf32>
    %cst_19 = arith.constant 1.000000e+00 : f32
    %52 = vector.broadcast %cst_19 : f32 to vector<8x128xf32>
    %53 = arith.addf %52, %51 : vector<8x128xf32>
    %54 = arith.divf %52, %53 : vector<8x128xf32>
    %55 = vector.extract_strided_slice %48 {offsets = [0, 256], sizes = [8, 128], strides = [1, 1]} : vector<8x384xf32> to vector<8x128xf32>
    %56 = math.tanh %55 : vector<8x128xf32>
    %cst_20 = arith.constant 1.000000e+00 : f32
    %57 = vector.broadcast %cst_20 : f32 to vector<8x128xf32>
    %58 = arith.subf %57, %54 : vector<8x128xf32>
    %59 = arith.mulf %58, %56 : vector<8x128xf32>
    %60 = vector.extract_strided_slice %46 {offsets = [8, 0], sizes = [8, 384], strides = [1, 1]} : vector<64x384xf32> to vector<8x384xf32>
    %61 = arith.truncf %59 : vector<8x128xf32> to vector<8x128xbf16>
    %cst_21 = arith.constant dense<0.000000e+00> : vector<8x384xf32>
    %62 = tpu.matmul %61, %47, %cst_21 {dimension_numbers = #tpu.dot_dimension_numbers<[1], [0], [0], [1], [0, 0, 1, 1], [], []>} : vector<8x128xbf16>, vector<128x384xbf16>, vector<8x384xf32> -> vector<8x384xf32>
    %63 = vector.extract_strided_slice %60 {offsets = [0, 0], sizes = [8, 128], strides = [1, 1]} : vector<8x384xf32> to vector<8x128xf32>
    %64 = vector.extract_strided_slice %62 {offsets = [0, 0], sizes = [8, 128], strides = [1, 1]} : vector<8x384xf32> to vector<8x128xf32>
    %65 = arith.addf %63, %64 : vector<8x128xf32>
    %66 = arith.negf %65 : vector<8x128xf32>
    %67 = math.exp %66 : vector<8x128xf32>
    %cst_22 = arith.constant 1.000000e+00 : f32
    %68 = vector.broadcast %cst_22 : f32 to vector<8x128xf32>
    %69 = arith.addf %68, %67 : vector<8x128xf32>
    %70 = arith.divf %68, %69 : vector<8x128xf32>
    %71 = vector.extract_strided_slice %60 {offsets = [0, 128], sizes = [8, 128], strides = [1, 1]} : vector<8x384xf32> to vector<8x128xf32>
    %72 = vector.extract_strided_slice %62 {offsets = [0, 128], sizes = [8, 128], strides = [1, 1]} : vector<8x384xf32> to vector<8x128xf32>
    %73 = arith.addf %71, %72 : vector<8x128xf32>
    %74 = arith.negf %73 : vector<8x128xf32>
    %75 = math.exp %74 : vector<8x128xf32>
    %cst_23 = arith.constant 1.000000e+00 : f32
    %76 = vector.broadcast %cst_23 : f32 to vector<8x128xf32>
    %77 = arith.addf %76, %75 : vector<8x128xf32>
    %78 = arith.divf %76, %77 : vector<8x128xf32>
    %79 = vector.extract_strided_slice %60 {offsets = [0, 256], sizes = [8, 128], strides = [1, 1]} : vector<8x384xf32> to vector<8x128xf32>
    %80 = vector.extract_strided_slice %62 {offsets = [0, 256], sizes = [8, 128], strides = [1, 1]} : vector<8x384xf32> to vector<8x128xf32>
    %81 = arith.mulf %70, %80 : vector<8x128xf32>
    %82 = arith.addf %79, %81 : vector<8x128xf32>
    %83 = math.tanh %82 : vector<8x128xf32>
    %cst_24 = arith.constant 1.000000e+00 : f32
    %84 = vector.broadcast %cst_24 : f32 to vector<8x128xf32>
    %85 = arith.subf %84, %78 : vector<8x128xf32>
    %86 = arith.mulf %85, %83 : vector<8x128xf32>
    %87 = arith.mulf %78, %59 : vector<8x128xf32>
    %88 = arith.addf %86, %87 : vector<8x128xf32>
    %89 = vector.extract_strided_slice %46 {offsets = [16, 0], sizes = [8, 384], strides = [1, 1]} : vector<64x384xf32> to vector<8x384xf32>
    %90 = arith.truncf %88 : vector<8x128xf32> to vector<8x128xbf16>
    %cst_25 = arith.constant dense<0.000000e+00> : vector<8x384xf32>
    %91 = tpu.matmul %90, %47, %cst_25 {dimension_numbers = #tpu.dot_dimension_numbers<[1], [0], [0], [1], [0, 0, 1, 1], [], []>} : vector<8x128xbf16>, vector<128x384xbf16>, vector<8x384xf32> -> vector<8x384xf32>
    %92 = vector.extract_strided_slice %89 {offsets = [0, 0], sizes = [8, 128], strides = [1, 1]} : vector<8x384xf32> to vector<8x128xf32>
    %93 = vector.extract_strided_slice %91 {offsets = [0, 0], sizes = [8, 128], strides = [1, 1]} : vector<8x384xf32> to vector<8x128xf32>
    %94 = arith.addf %92, %93 : vector<8x128xf32>
    %95 = arith.negf %94 : vector<8x128xf32>
    %96 = math.exp %95 : vector<8x128xf32>
    %cst_26 = arith.constant 1.000000e+00 : f32
    %97 = vector.broadcast %cst_26 : f32 to vector<8x128xf32>
    %98 = arith.addf %97, %96 : vector<8x128xf32>
    %99 = arith.divf %97, %98 : vector<8x128xf32>
    %100 = vector.extract_strided_slice %89 {offsets = [0, 128], sizes = [8, 128], strides = [1, 1]} : vector<8x384xf32> to vector<8x128xf32>
    %101 = vector.extract_strided_slice %91 {offsets = [0, 128], sizes = [8, 128], strides = [1, 1]} : vector<8x384xf32> to vector<8x128xf32>
    %102 = arith.addf %100, %101 : vector<8x128xf32>
    %103 = arith.negf %102 : vector<8x128xf32>
    %104 = math.exp %103 : vector<8x128xf32>
    %cst_27 = arith.constant 1.000000e+00 : f32
    %105 = vector.broadcast %cst_27 : f32 to vector<8x128xf32>
    %106 = arith.addf %105, %104 : vector<8x128xf32>
    %107 = arith.divf %105, %106 : vector<8x128xf32>
    %108 = vector.extract_strided_slice %89 {offsets = [0, 256], sizes = [8, 128], strides = [1, 1]} : vector<8x384xf32> to vector<8x128xf32>
    %109 = vector.extract_strided_slice %91 {offsets = [0, 256], sizes = [8, 128], strides = [1, 1]} : vector<8x384xf32> to vector<8x128xf32>
    %110 = arith.mulf %99, %109 : vector<8x128xf32>
    %111 = arith.addf %108, %110 : vector<8x128xf32>
    %112 = math.tanh %111 : vector<8x128xf32>
    %cst_28 = arith.constant 1.000000e+00 : f32
    %113 = vector.broadcast %cst_28 : f32 to vector<8x128xf32>
    %114 = arith.subf %113, %107 : vector<8x128xf32>
    %115 = arith.mulf %114, %112 : vector<8x128xf32>
    %116 = arith.mulf %107, %88 : vector<8x128xf32>
    %117 = arith.addf %115, %116 : vector<8x128xf32>
    %118 = vector.extract_strided_slice %46 {offsets = [24, 0], sizes = [8, 384], strides = [1, 1]} : vector<64x384xf32> to vector<8x384xf32>
    %119 = arith.truncf %117 : vector<8x128xf32> to vector<8x128xbf16>
    %cst_29 = arith.constant dense<0.000000e+00> : vector<8x384xf32>
    %120 = tpu.matmul %119, %47, %cst_29 {dimension_numbers = #tpu.dot_dimension_numbers<[1], [0], [0], [1], [0, 0, 1, 1], [], []>} : vector<8x128xbf16>, vector<128x384xbf16>, vector<8x384xf32> -> vector<8x384xf32>
    %121 = vector.extract_strided_slice %118 {offsets = [0, 0], sizes = [8, 128], strides = [1, 1]} : vector<8x384xf32> to vector<8x128xf32>
    %122 = vector.extract_strided_slice %120 {offsets = [0, 0], sizes = [8, 128], strides = [1, 1]} : vector<8x384xf32> to vector<8x128xf32>
    %123 = arith.addf %121, %122 : vector<8x128xf32>
    %124 = arith.negf %123 : vector<8x128xf32>
    %125 = math.exp %124 : vector<8x128xf32>
    %cst_30 = arith.constant 1.000000e+00 : f32
    %126 = vector.broadcast %cst_30 : f32 to vector<8x128xf32>
    %127 = arith.addf %126, %125 : vector<8x128xf32>
    %128 = arith.divf %126, %127 : vector<8x128xf32>
    %129 = vector.extract_strided_slice %118 {offsets = [0, 128], sizes = [8, 128], strides = [1, 1]} : vector<8x384xf32> to vector<8x128xf32>
    %130 = vector.extract_strided_slice %120 {offsets = [0, 128], sizes = [8, 128], strides = [1, 1]} : vector<8x384xf32> to vector<8x128xf32>
    %131 = arith.addf %129, %130 : vector<8x128xf32>
    %132 = arith.negf %131 : vector<8x128xf32>
    %133 = math.exp %132 : vector<8x128xf32>
    %cst_31 = arith.constant 1.000000e+00 : f32
    %134 = vector.broadcast %cst_31 : f32 to vector<8x128xf32>
    %135 = arith.addf %134, %133 : vector<8x128xf32>
    %136 = arith.divf %134, %135 : vector<8x128xf32>
    %137 = vector.extract_strided_slice %118 {offsets = [0, 256], sizes = [8, 128], strides = [1, 1]} : vector<8x384xf32> to vector<8x128xf32>
    %138 = vector.extract_strided_slice %120 {offsets = [0, 256], sizes = [8, 128], strides = [1, 1]} : vector<8x384xf32> to vector<8x128xf32>
    %139 = arith.mulf %128, %138 : vector<8x128xf32>
    %140 = arith.addf %137, %139 : vector<8x128xf32>
    %141 = math.tanh %140 : vector<8x128xf32>
    %cst_32 = arith.constant 1.000000e+00 : f32
    %142 = vector.broadcast %cst_32 : f32 to vector<8x128xf32>
    %143 = arith.subf %142, %136 : vector<8x128xf32>
    %144 = arith.mulf %143, %141 : vector<8x128xf32>
    %145 = arith.mulf %136, %117 : vector<8x128xf32>
    %146 = arith.addf %144, %145 : vector<8x128xf32>
    %147 = vector.extract_strided_slice %46 {offsets = [32, 0], sizes = [8, 384], strides = [1, 1]} : vector<64x384xf32> to vector<8x384xf32>
    %148 = arith.truncf %146 : vector<8x128xf32> to vector<8x128xbf16>
    %cst_33 = arith.constant dense<0.000000e+00> : vector<8x384xf32>
    %149 = tpu.matmul %148, %47, %cst_33 {dimension_numbers = #tpu.dot_dimension_numbers<[1], [0], [0], [1], [0, 0, 1, 1], [], []>} : vector<8x128xbf16>, vector<128x384xbf16>, vector<8x384xf32> -> vector<8x384xf32>
    %150 = vector.extract_strided_slice %147 {offsets = [0, 0], sizes = [8, 128], strides = [1, 1]} : vector<8x384xf32> to vector<8x128xf32>
    %151 = vector.extract_strided_slice %149 {offsets = [0, 0], sizes = [8, 128], strides = [1, 1]} : vector<8x384xf32> to vector<8x128xf32>
    %152 = arith.addf %150, %151 : vector<8x128xf32>
    %153 = arith.negf %152 : vector<8x128xf32>
    %154 = math.exp %153 : vector<8x128xf32>
    %cst_34 = arith.constant 1.000000e+00 : f32
    %155 = vector.broadcast %cst_34 : f32 to vector<8x128xf32>
    %156 = arith.addf %155, %154 : vector<8x128xf32>
    %157 = arith.divf %155, %156 : vector<8x128xf32>
    %158 = vector.extract_strided_slice %147 {offsets = [0, 128], sizes = [8, 128], strides = [1, 1]} : vector<8x384xf32> to vector<8x128xf32>
    %159 = vector.extract_strided_slice %149 {offsets = [0, 128], sizes = [8, 128], strides = [1, 1]} : vector<8x384xf32> to vector<8x128xf32>
    %160 = arith.addf %158, %159 : vector<8x128xf32>
    %161 = arith.negf %160 : vector<8x128xf32>
    %162 = math.exp %161 : vector<8x128xf32>
    %cst_35 = arith.constant 1.000000e+00 : f32
    %163 = vector.broadcast %cst_35 : f32 to vector<8x128xf32>
    %164 = arith.addf %163, %162 : vector<8x128xf32>
    %165 = arith.divf %163, %164 : vector<8x128xf32>
    %166 = vector.extract_strided_slice %147 {offsets = [0, 256], sizes = [8, 128], strides = [1, 1]} : vector<8x384xf32> to vector<8x128xf32>
    %167 = vector.extract_strided_slice %149 {offsets = [0, 256], sizes = [8, 128], strides = [1, 1]} : vector<8x384xf32> to vector<8x128xf32>
    %168 = arith.mulf %157, %167 : vector<8x128xf32>
    %169 = arith.addf %166, %168 : vector<8x128xf32>
    %170 = math.tanh %169 : vector<8x128xf32>
    %cst_36 = arith.constant 1.000000e+00 : f32
    %171 = vector.broadcast %cst_36 : f32 to vector<8x128xf32>
    %172 = arith.subf %171, %165 : vector<8x128xf32>
    %173 = arith.mulf %172, %170 : vector<8x128xf32>
    %174 = arith.mulf %165, %146 : vector<8x128xf32>
    %175 = arith.addf %173, %174 : vector<8x128xf32>
    %176 = vector.extract_strided_slice %46 {offsets = [40, 0], sizes = [8, 384], strides = [1, 1]} : vector<64x384xf32> to vector<8x384xf32>
    %177 = arith.truncf %175 : vector<8x128xf32> to vector<8x128xbf16>
    %cst_37 = arith.constant dense<0.000000e+00> : vector<8x384xf32>
    %178 = tpu.matmul %177, %47, %cst_37 {dimension_numbers = #tpu.dot_dimension_numbers<[1], [0], [0], [1], [0, 0, 1, 1], [], []>} : vector<8x128xbf16>, vector<128x384xbf16>, vector<8x384xf32> -> vector<8x384xf32>
    %179 = vector.extract_strided_slice %176 {offsets = [0, 0], sizes = [8, 128], strides = [1, 1]} : vector<8x384xf32> to vector<8x128xf32>
    %180 = vector.extract_strided_slice %178 {offsets = [0, 0], sizes = [8, 128], strides = [1, 1]} : vector<8x384xf32> to vector<8x128xf32>
    %181 = arith.addf %179, %180 : vector<8x128xf32>
    %182 = arith.negf %181 : vector<8x128xf32>
    %183 = math.exp %182 : vector<8x128xf32>
    %cst_38 = arith.constant 1.000000e+00 : f32
    %184 = vector.broadcast %cst_38 : f32 to vector<8x128xf32>
    %185 = arith.addf %184, %183 : vector<8x128xf32>
    %186 = arith.divf %184, %185 : vector<8x128xf32>
    %187 = vector.extract_strided_slice %176 {offsets = [0, 128], sizes = [8, 128], strides = [1, 1]} : vector<8x384xf32> to vector<8x128xf32>
    %188 = vector.extract_strided_slice %178 {offsets = [0, 128], sizes = [8, 128], strides = [1, 1]} : vector<8x384xf32> to vector<8x128xf32>
    %189 = arith.addf %187, %188 : vector<8x128xf32>
    %190 = arith.negf %189 : vector<8x128xf32>
    %191 = math.exp %190 : vector<8x128xf32>
    %cst_39 = arith.constant 1.000000e+00 : f32
    %192 = vector.broadcast %cst_39 : f32 to vector<8x128xf32>
    %193 = arith.addf %192, %191 : vector<8x128xf32>
    %194 = arith.divf %192, %193 : vector<8x128xf32>
    %195 = vector.extract_strided_slice %176 {offsets = [0, 256], sizes = [8, 128], strides = [1, 1]} : vector<8x384xf32> to vector<8x128xf32>
    %196 = vector.extract_strided_slice %178 {offsets = [0, 256], sizes = [8, 128], strides = [1, 1]} : vector<8x384xf32> to vector<8x128xf32>
    %197 = arith.mulf %186, %196 : vector<8x128xf32>
    %198 = arith.addf %195, %197 : vector<8x128xf32>
    %199 = math.tanh %198 : vector<8x128xf32>
    %cst_40 = arith.constant 1.000000e+00 : f32
    %200 = vector.broadcast %cst_40 : f32 to vector<8x128xf32>
    %201 = arith.subf %200, %194 : vector<8x128xf32>
    %202 = arith.mulf %201, %199 : vector<8x128xf32>
    %203 = arith.mulf %194, %175 : vector<8x128xf32>
    %204 = arith.addf %202, %203 : vector<8x128xf32>
    %205 = vector.extract_strided_slice %46 {offsets = [48, 0], sizes = [8, 384], strides = [1, 1]} : vector<64x384xf32> to vector<8x384xf32>
    %206 = arith.truncf %204 : vector<8x128xf32> to vector<8x128xbf16>
    %cst_41 = arith.constant dense<0.000000e+00> : vector<8x384xf32>
    %207 = tpu.matmul %206, %47, %cst_41 {dimension_numbers = #tpu.dot_dimension_numbers<[1], [0], [0], [1], [0, 0, 1, 1], [], []>} : vector<8x128xbf16>, vector<128x384xbf16>, vector<8x384xf32> -> vector<8x384xf32>
    %208 = vector.extract_strided_slice %205 {offsets = [0, 0], sizes = [8, 128], strides = [1, 1]} : vector<8x384xf32> to vector<8x128xf32>
    %209 = vector.extract_strided_slice %207 {offsets = [0, 0], sizes = [8, 128], strides = [1, 1]} : vector<8x384xf32> to vector<8x128xf32>
    %210 = arith.addf %208, %209 : vector<8x128xf32>
    %211 = arith.negf %210 : vector<8x128xf32>
    %212 = math.exp %211 : vector<8x128xf32>
    %cst_42 = arith.constant 1.000000e+00 : f32
    %213 = vector.broadcast %cst_42 : f32 to vector<8x128xf32>
    %214 = arith.addf %213, %212 : vector<8x128xf32>
    %215 = arith.divf %213, %214 : vector<8x128xf32>
    %216 = vector.extract_strided_slice %205 {offsets = [0, 128], sizes = [8, 128], strides = [1, 1]} : vector<8x384xf32> to vector<8x128xf32>
    %217 = vector.extract_strided_slice %207 {offsets = [0, 128], sizes = [8, 128], strides = [1, 1]} : vector<8x384xf32> to vector<8x128xf32>
    %218 = arith.addf %216, %217 : vector<8x128xf32>
    %219 = arith.negf %218 : vector<8x128xf32>
    %220 = math.exp %219 : vector<8x128xf32>
    %cst_43 = arith.constant 1.000000e+00 : f32
    %221 = vector.broadcast %cst_43 : f32 to vector<8x128xf32>
    %222 = arith.addf %221, %220 : vector<8x128xf32>
    %223 = arith.divf %221, %222 : vector<8x128xf32>
    %224 = vector.extract_strided_slice %205 {offsets = [0, 256], sizes = [8, 128], strides = [1, 1]} : vector<8x384xf32> to vector<8x128xf32>
    %225 = vector.extract_strided_slice %207 {offsets = [0, 256], sizes = [8, 128], strides = [1, 1]} : vector<8x384xf32> to vector<8x128xf32>
    %226 = arith.mulf %215, %225 : vector<8x128xf32>
    %227 = arith.addf %224, %226 : vector<8x128xf32>
    %228 = math.tanh %227 : vector<8x128xf32>
    %cst_44 = arith.constant 1.000000e+00 : f32
    %229 = vector.broadcast %cst_44 : f32 to vector<8x128xf32>
    %230 = arith.subf %229, %223 : vector<8x128xf32>
    %231 = arith.mulf %230, %228 : vector<8x128xf32>
    %232 = arith.mulf %223, %204 : vector<8x128xf32>
    %233 = arith.addf %231, %232 : vector<8x128xf32>
    %234 = vector.extract_strided_slice %46 {offsets = [56, 0], sizes = [8, 384], strides = [1, 1]} : vector<64x384xf32> to vector<8x384xf32>
    %235 = arith.truncf %233 : vector<8x128xf32> to vector<8x128xbf16>
    %cst_45 = arith.constant dense<0.000000e+00> : vector<8x384xf32>
    %236 = tpu.matmul %235, %47, %cst_45 {dimension_numbers = #tpu.dot_dimension_numbers<[1], [0], [0], [1], [0, 0, 1, 1], [], []>} : vector<8x128xbf16>, vector<128x384xbf16>, vector<8x384xf32> -> vector<8x384xf32>
    %237 = vector.extract_strided_slice %234 {offsets = [0, 0], sizes = [8, 128], strides = [1, 1]} : vector<8x384xf32> to vector<8x128xf32>
    %238 = vector.extract_strided_slice %236 {offsets = [0, 0], sizes = [8, 128], strides = [1, 1]} : vector<8x384xf32> to vector<8x128xf32>
    %239 = arith.addf %237, %238 : vector<8x128xf32>
    %240 = arith.negf %239 : vector<8x128xf32>
    %241 = math.exp %240 : vector<8x128xf32>
    %cst_46 = arith.constant 1.000000e+00 : f32
    %242 = vector.broadcast %cst_46 : f32 to vector<8x128xf32>
    %243 = arith.addf %242, %241 : vector<8x128xf32>
    %244 = arith.divf %242, %243 : vector<8x128xf32>
    %245 = vector.extract_strided_slice %234 {offsets = [0, 128], sizes = [8, 128], strides = [1, 1]} : vector<8x384xf32> to vector<8x128xf32>
    %246 = vector.extract_strided_slice %236 {offsets = [0, 128], sizes = [8, 128], strides = [1, 1]} : vector<8x384xf32> to vector<8x128xf32>
    %247 = arith.addf %245, %246 : vector<8x128xf32>
    %248 = arith.negf %247 : vector<8x128xf32>
    %249 = math.exp %248 : vector<8x128xf32>
    %cst_47 = arith.constant 1.000000e+00 : f32
    %250 = vector.broadcast %cst_47 : f32 to vector<8x128xf32>
    %251 = arith.addf %250, %249 : vector<8x128xf32>
    %252 = arith.divf %250, %251 : vector<8x128xf32>
    %253 = vector.extract_strided_slice %234 {offsets = [0, 256], sizes = [8, 128], strides = [1, 1]} : vector<8x384xf32> to vector<8x128xf32>
    %254 = vector.extract_strided_slice %236 {offsets = [0, 256], sizes = [8, 128], strides = [1, 1]} : vector<8x384xf32> to vector<8x128xf32>
    %255 = arith.mulf %244, %254 : vector<8x128xf32>
    %256 = arith.addf %253, %255 : vector<8x128xf32>
    %257 = math.tanh %256 : vector<8x128xf32>
    %cst_48 = arith.constant 1.000000e+00 : f32
    %258 = vector.broadcast %cst_48 : f32 to vector<8x128xf32>
    %259 = arith.subf %258, %252 : vector<8x128xf32>
    %260 = arith.mulf %259, %257 : vector<8x128xf32>
    %261 = arith.mulf %252, %233 : vector<8x128xf32>
    %262 = arith.addf %260, %261 : vector<8x128xf32>
    %263 = vector.extract_strided_slice %262 {offsets = [0, 0], sizes = [2, 128], strides = [1, 1]} : vector<8x128xf32> to vector<2x128xf32>
    %264 = tpu.concatenate %35, %263 in 1 : vector<2x32xf32>, vector<2x128xf32> -> vector<2x160xf32>
    %c0_49 = arith.constant 0 : index
    %c0_50 = arith.constant 0 : index
    %265 = vector.load %arg7[%c0_49, %c0_50] : memref<2x160xf32, #tpu.memory_space<vmem>>, vector<2x160xf32>
    tpu.vector_store %arg7[%c0_49, %c0_50], %264 {strides = array<i32>} : memref<2x160xf32, #tpu.memory_space<vmem>>, vector<2x160xf32>,
    return
  }
}

</mosaic_0001>

<bundles_post_ra>
// kernel: forward.1
= control target key start
LH: loop header
LB: loop body
LE: loop exit
PB: predicated region body
PF: predicated region fallthrough
CT: control target
= control target key end

     0   :  { %14 = vsyncpa [#allocation3], 0  ;;  %s2046_s0 = inlined_call_operand.vmem [shape: f32[2,32], index: 0, kind: input, shape index: {}]   ;;  %s2047_s1 = inlined_call_operand.hbm [shape: f32[2,64], index: 1, kind: input, shape index: {}, may-alias: {1,8}]   ;;  %s2048_s2 = inlined_call_operand.vmem [shape: s32[64,1], index: 2, kind: input, shape index: {}]   ;;  %s2049_s3 = inlined_call_operand.vmem [shape: bf16[64,128], index: 3, kind: input, shape index: {}]   ;;  %s2050_s4 = inlined_call_operand.vmem [shape: f32[1,128], index: 4, kind: input, shape index: {}]   ;;  %s2051_s5 = inlined_call_operand.vmem [shape: bf16[16,384], index: 5, kind: input, shape index: {}]   ;;  %s2052_s6 = inlined_call_operand.hbm [shape: bf16[128,384], index: 6, kind: input, shape index: {}]   ;;  %s2053_s7 = inlined_call_operand.hbm [shape: f32[2,160], index: 7, kind: output, shape index: {0}]   ;;  %s2054_s8 = inlined_call_operand.hbm [shape: f32[2,64], index: 8, kind: output, shape index: {1}, may-alias: {1,8}]  }
   0x1   :  { %15 = vsyncpa [#allocation6], 0 }
   0x2   :  { %16 = vsyncpa [#allocation4], 0 }
   0x3   :  { %17 = vsyncpa [#allocation9], 0  ;;  %s25_s29 = sshll.u32 %s2047_s1, 4  ;;  %s1580_s30 = smov [#allocation2]   ;;  %s26_s29 = int_to_ptr.hbm [resolvable:$true] %s25_s29 }
   0x4   :  { %s27_s9 = sshll.u32 %s1580_s30, 4  ;;  %s43_s12 = sshll.u32 %s2052_s6, 4  ;;  %s28_s9 = int_to_ptr.vmem [resolvable:$true] %s27_s9  ;;  %s44_s12 = int_to_ptr.hbm [resolvable:$true] %s43_s12 }
   0x5   :  { %30 = dma.hbm_to_vmem [thread:$0]  %s26_s29, 32, %s28_s9, [#allocation3]  }
   0x6   :  { %s1581_s13 = smov [#allocation5]   ;;  %s1582_s15 = smov 192  }
   0x7   :  { %s45_s14 = sshll.u32 %s1581_s13, 4  ;;  %s1583_s16 = smov 12   ;;  %s46_s14 = int_to_ptr.vmem [resolvable:$true] %s45_s14 }
   0x8   :  { %51 = dma.hbm_to_vmem [thread:$0]  %s44_s12, 3072, %s46_s14, [#allocation6], %s1582_s15, %s1582_s15, %s1583_s16  }
   0x9   :  { %1572 = dma.done.wait [#allocation3], 32  }
   0xa   :  { %1573 = vsyncadd [#allocation3], 4294967264 }
   0xb   :  { %1574 = dma.done.wait [#allocation6], 3072  }
   0xc   :  { %1575 = vsyncadd [#allocation6], 4294964224  ;;  %v1584_v0 = vmov 0   ;;  %v167_v1 = vld [vmem:[%s2048_s2] sm:$0xff]  ;;  %v169_v2 = vld [vmem:[%s2048_s2 + $0x10] sm:$0xff]  ;;  %s1585_s23 = smov 32   ;;  %v175_v23 = vlaneseq }
   0xd   :  { %1388 = vset.pattern.permute.xlu0 %v1584_v0  ;;  %1389 = vset.pattern.permute.xlu1 %v1584_v0  ;;  %v168_v3 = vld [vmem:[%s2048_s2 + $0x8] sm:$0xff]  ;;  %v170_v4 = vld [vmem:[%s2048_s2 + $0x18] sm:$0xff]  ;;  %v1653_v5 = vld [vmem:[#allocation2] sm:$0x3]  ;;  %v1586_v28 = vmov 0.0   ;;  %vm249_vm2 = vcmask 130048  }
   0xe   :  { %1390 = vset.pattern.permute.xlu2 %v1584_v0  ;;  %178 = vperm.xlu0 %1388, %v167_v1   ;;  %v171_v6 = vld [vmem:[%s2048_s2 + $0x20] sm:$0xff]  ;;  %v173_v7 = vld [vmem:[%s2048_s2 + $0x30] sm:$0xff]  ;;  %v1350_v8 = vld [vmem:[%s2049_s3 + $0x18] sm:$0xff]  ;;  %v176_v25 = vand.u32 127, %v175_v23  ;;  %vm67_vm3 = vcmask 261120   ;;  %vm106_vm4 = vcmask 523264  }
   0xf   :  { %184 = vperm.xlu1 %1389, %v169_v2   ;;  %190 = vperm.xlu2 %1390, %v171_v6   ;;  %v1349_v9 = vld [vmem:[%s2049_s3 + $0x10] sm:$0xff]  ;;  %v1214_v10 = vld [vmem:[%s2051_s5] sm:$0xf]  ;;  %v1352_v11 = vld [vmem:[%s2051_s5 + $0x8] sm:$0xf0]  ;;  %s1588_s29 = smov [#allocation8]  }
  0x10   :  { %114 = vmatpush.bf16.msra.mxu0 %v1350_v8  ;;  %v1215_v12 = vor.u32 %v1352_v11, %v1214_v10  ;;  %v1351_v13 = vld [vmem:[%s2051_s5 + $0x4] sm:$0xf]  ;;  %v1216_v14 = vld [vmem:[%s2051_s5 + $0xc] sm:$0xf0]  ;;  %v1222_v15 = vld [vmem:[%s2051_s5 + $0x8] sm:$0xf] }
  0x11   :  { %v1219_v16 = vor.u32 %v1351_v13, %v1216_v14  ;;  %v1353_v17 = vld [vmem:[%s2051_s5 + $0x10] sm:$0xf0]  ;;  %v172_v19 = vld [vmem:[%s2048_s2 + $0x28] sm:$0xff]  ;;  %v1347_v21 = vld [vmem:[%s2049_s3] sm:$0xff]  ;;  %s1168_s30 = sshll.u32 %s1588_s29, 4  ;;  %s1170_s11 = sshll.u32 %s2054_s8, 4  ;;  %s1169_s30 = int_to_ptr.vmem [resolvable:$true] %s1168_s30  ;;  %s1171_s11 = int_to_ptr.hbm [resolvable:$true] %s1170_s11 }
  0x12   :  { %269 = vmatpush.bf16.msra.mxu1 %v1215_v12  ;;  %v1223_v18 = vor.u32 %v1353_v17, %v1222_v15  ;;  %v1348_v20 = vld [vmem:[%s2049_s3 + $0x8] sm:$0xff]  ;;  %v174_v22 = vld [vmem:[%s2048_s2 + $0x38] sm:$0xff]  ;;  %v61_v32 = vld [vmem:[%s2046_s0] sm:$0x3]  ;;  %s1589_s12 = smov [#allocation7]   ;;  %s1159_s16 = sshll.u32 %s2053_s7, 4  ;;  %s1160_s16 = int_to_ptr.hbm [resolvable:$true] %s1159_s16 }
  0x13   :  { %297 = vmatpush.bf16.msra.mxu2 %v1219_v16  ;;  %v1375_v40 = vld [vmem:[#allocation5 + $0xac] sm:$0xf]  ;;  %v1325_v41 = vld [vmem:[#allocation5 + $0xb4] sm:$0xf0]  ;;  %v1372_v42 = vld [vmem:[#allocation5 + $0x94] sm:$0xf] }
  0x14   :  { %115 = vmatpush.bf16.msra.mxu0 %v1349_v9  ;;  %326 = vmatpush.bf16.msra.mxu3 %v1223_v18  ;;  %v1709_v44 = vor.u32 %v1375_v40, %v1325_v41  ;;  %v1313_v45 = vld [vmem:[#allocation5 + $0x9c] sm:$0xf0]  ;;  %v1331_v56 = vld [vmem:[#allocation5 + $0xb0] sm:$0xf]  ;;  %v1377_v57 = vld [vmem:[#allocation5 + $0xb8] sm:$0xf0] }
  0x15   :  { %v1712_v46 = vor.u32 %v1372_v42, %v1313_v45  ;;  %v1369_v58 = vld [vmem:[#allocation5 + $0x7c] sm:$0xf]  ;;  %v1721_v59 = vor.u32 %v1377_v57, %v1331_v56  ;;  %v1301_v60 = vld [vmem:[#allocation5 + $0x84] sm:$0xf0]  ;;  %v1376_v63 = vld [vmem:[#allocation5 + $0xb0] sm:$0xf0] }
  0x16   :  { %181 = vperm.xlu0 %1388, %v168_v3   ;;  %544 = vmatpush.bf16.msrb.mxu1 %v1709_v44  ;;  %v1723_v61 = vor.u32 %v1369_v58, %v1301_v60  ;;  %v1323_v62 = vld [vmem:[#allocation5 + $0xa8] sm:$0xf]  ;;  %v1319_v1 = vld [vmem:[#allocation5 + $0x98] sm:$0xf]  ;;  %v1374_v2 = vld [vmem:[#allocation5 + $0xa0] sm:$0xf0] }
  0x17   :  { %187 = vperm.xlu1 %1389, %v170_v4   ;;  %193 = vperm.xlu2 %1390, %v172_v19   ;;  %v1727_v0 = vor.u32 %v1376_v63, %v1323_v62  ;;  %v1311_v3 = vld [vmem:[#allocation5 + $0x90] sm:$0xf]  ;;  %v1731_v4 = vor.u32 %v1374_v2, %v1319_v1  ;;  %v1373_v6 = vld [vmem:[#allocation5 + $0x98] sm:$0xf0]  ;;  %v1307_v8 = vld [vmem:[#allocation5 + $0x80] sm:$0xf] }
  0x18   :  { %116 = vmatpush.bf16.msra.mxu0 %v1348_v20  ;;  %557 = vmatpush.bf16.msrb.mxu2 %v1721_v59  ;;  %v1371_v9 = vld [vmem:[#allocation5 + $0x88] sm:$0xf0]  ;;  %v1299_v10 = vld [vmem:[#allocation5 + $0x78] sm:$0xf]  ;;  %v1370_v12 = vld [vmem:[#allocation5 + $0x80] sm:$0xf0] }
  0x19   :  { %618 = vmatpush.bf16.msrb.mxu3 %v1727_v0  ;;  %v1738_v11 = vor.u32 %v1371_v9, %v1307_v8  ;;  %v1740_v13 = vor.u32 %v1370_v12, %v1299_v10  ;;  %v1366_v14 = vld [vmem:[#allocation5 + $0x64] sm:$0xf]  ;;  %v1289_v15 = vld [vmem:[#allocation5 + $0x6c] sm:$0xf0]  ;;  %v1287_v16 = vld [vmem:[#allocation5 + $0x60] sm:$0xf] }
  0x1a   :  { %545 = vmatpush.bf16.msrb.mxu1 %v1712_v46  ;;  %v1745_v17 = vor.u32 %v1366_v14, %v1289_v15  ;;  %v1367_v18 = vld [vmem:[#allocation5 + $0x68] sm:$0xf0]  ;;  %v1295_v19 = vld [vmem:[#allocation5 + $0x68] sm:$0xf]  ;;  %v1368_v20 = vld [vmem:[#allocation5 + $0x70] sm:$0xf0] }
  0x1b   :  { %v1363_v23 = vld [vmem:[#allocation5 + $0x4c] sm:$0xf]  ;;  %v1251_v41 = vld [vmem:[#allocation5 + $0x18] sm:$0xf]  ;;  %v1358_v42 = vld [vmem:[#allocation5 + $0x20] sm:$0xf0] }
  0x1c   :  { %117 = vmatpush.bf16.msra.mxu0 %v1347_v21  ;;  %558 = vmatpush.bf16.msrb.mxu2 %v1731_v4  ;;  %v1747_v21 = vor.u32 %v1367_v18, %v1287_v16  ;;  %v1253_v45 = vld [vmem:[#allocation5 + $0x24] sm:$0xf0]  ;;  %v1355_v56 = vld [vmem:[#allocation5 + $0x8] sm:$0xf0]  ;;  %v1356_v58 = vld [vmem:[#allocation5 + $0x10] sm:$0xf0] }
  0x1d   :  { %v1247_v57 = vld [vmem:[#allocation5 + $0x8] sm:$0xf]  ;;  %v1391_v62 = vld [vmem:[%s2050_s4] ss:$0 sm:$0xff]  ;;  %s1587_s4 = smov 64   ;;  %s1157_s13 = sshll.u32 %s1589_s12, 4  ;;  %s1158_s13 = int_to_ptr.vmem [resolvable:$true] %s1157_s13 }
  0x1e   :  { %64 = vrot.lane.b32.xlu0 %v1653_v5, %s1585_s23  ;;  %546 = vmatpush.bf16.msrb.mxu1 %v1723_v61  ;;  %v1791_v1 = vor.u32 %v1356_v58, %v1247_v57 }
  0x1f   :  { %196 = vperm.xlu1 %1389, %v173_v7   ;;  %199 = vperm.xlu2 %1390, %v174_v22   ;;  %v1733_v7 = vor.u32 %v1373_v6, %v1311_v3  ;;  %v1749_v22 = vor.u32 %v1368_v20, %v1295_v19 }
  0x20   :  { %531 = vmatpush.bf16.msrb.mxu0 %v1727_v0  ;;  %559 = vmatpush.bf16.msrb.mxu2 %v1738_v11 }
  0x21   :  { %619 = vmatpush.bf16.msrb.mxu3 %v1733_v7 }
  0x22   :  { %547 = vmatpush.bf16.msrb.mxu1 %v1745_v17 }
  0x24   :  { %532 = vmatpush.bf16.msrb.mxu0 %v1733_v7  ;;  %560 = vmatpush.bf16.msrb.mxu2 %v1749_v22 }
  0x25   :  { %620 = vmatpush.bf16.msrb.mxu3 %v1740_v13 }
  0x28   :  { %533 = vmatpush.bf16.msrb.mxu0 %v1740_v13 }
  0x29   :  { %621 = vmatpush.bf16.msrb.mxu3 %v1747_v21 }
  0x2c   :  { %534 = vmatpush.bf16.msrb.mxu0 %v1747_v21 }
  0x69   :  { %v191_v43 = vpop.permute.xlu2 %190 }
  0x6a   :  { %vm205_vm7 = vcmp.eq.s32.totalorder %v191_v43, %v176_v25  ;;  %v1357_v43 = vld [vmem:[#allocation5 + $0x1c] sm:$0xf] }
  0x6b   :  { %v1208_v47 = vsel %vm205_vm7, 1.0, %v1586_v28 }
  0x71   :  { %v194_v48 = vpop.permute.xlu2 %193 }
  0x72   :  { %vm206_vm8 = vcmp.eq.s32.totalorder %v194_v48, %v176_v25  ;;  %v1359_v48 = vld [vmem:[#allocation5 + $0x28] sm:$0xf0] }
  0x73   :  { %v1209_v49 = vsel %vm206_vm8, 1.0, %v1586_v28 }
  0x74   :  { %v227_v50 = vpack.c.bf16 %v1209_v49, %v1208_v47  ;;  %v1259_v47 = vld [vmem:[#allocation5 + $0x20] sm:$0xf]  ;;  %v1772_v49 = vor.u32 %v1357_v43, %v1253_v45 }
  0x79   :  { %v200_v51 = vpop.permute.xlu2 %199 }
  0x7a   :  { %vm208_vm9 = vcmp.eq.s32.totalorder %v200_v51, %v176_v25  ;;  %v1776_v51 = vor.u32 %v1358_v42, %v1251_v41 }
  0x7b   :  { %v1211_v52 = vsel %vm208_vm9, 1.0, %v1586_v28 }
  0x80   :  { %v179_v24 = vpop.permute.xlu0 %178 }
  0x81   :  { %v185_v26 = vpop.permute.xlu1 %184  ;;  %vm201_vm0 = vcmp.eq.s32.totalorder %v179_v24, %v176_v25  ;;  %v1277_v24 = vld [vmem:[#allocation5 + $0x54] sm:$0xf0] }
  0x82   :  { %v1204_v29 = vsel %vm201_vm0, 1.0, %v1586_v28  ;;  %vm203_vm5 = vcmp.eq.s32.totalorder %v185_v26, %v176_v25  ;;  %v1754_v26 = vor.u32 %v1363_v23, %v1277_v24 }
  0x83   :  { %v1206_v37 = vsel %vm203_vm5, 1.0, %v1586_v28 }
  0x84   :  { %548 = vmatpush.bf16.msrb.mxu1 %v1754_v26 }
  0x88   :  { %v182_v27 = vpop.permute.xlu0 %181 }
  0x89   :  { %vm202_vm1 = vcmp.eq.s32.totalorder %v182_v27, %v176_v25  ;;  %v188_v34 = vpop.permute.xlu1 %187  ;;  %v1364_v27 = vld [vmem:[#allocation5 + $0x50] sm:$0xf0] }
  0x8a   :  { %v1205_v30 = vsel %vm202_vm1, 1.0, %v1586_v28  ;;  %vm204_vm6 = vcmp.eq.s32.totalorder %v188_v34, %v176_v25  ;;  %v1263_v34 = vld [vmem:[#allocation5 + $0x30] sm:$0xf] }
  0x8b   :  { %v225_v31 = vpack.c.bf16 %v1205_v30, %v1204_v29  ;;  %v1207_v38 = vsel %vm204_vm6, 1.0, %v1586_v28  ;;  %v1365_v29 = vld [vmem:[#allocation5 + $0x58] sm:$0xf0] }
  0x8c   :  { %v226_v39 = vpack.c.bf16 %v1207_v38, %v1206_v37  ;;  %v1271_v37 = vld [vmem:[#allocation5 + $0x38] sm:$0xf]  ;;  %v1362_v38 = vld [vmem:[#allocation5 + $0x40] sm:$0xf0] }
  0x8d   :  { %1224 = vmatmul.msk.bf16.vlgmr.msra.gmra.mxu1 %vm249_vm2, %v225_v31  ;;  %1228 = vmatmul.msk.bf16.vlgmr.msra.gmra.mxu2 %vm249_vm2, %v225_v31  ;;  %v1768_v40 = vor.u32 %v1362_v38, %v1271_v37 }
  0x8e   :  { %1232 = vmatmul.msk.bf16.vlgmr.msra.gmra.mxu3 %vm249_vm2, %v225_v31 }
  0x90   :  { %v65_v33 = vpop.permute.xlu0 %64 }
  0x91   :  { %v68_v35 = vsel %vm67_vm3, %v61_v32, %v65_v33  ;;  %v197_v53 = vpop.permute.xlu1 %196  ;;  %v1360_v32 = vld [vmem:[#allocation5 + $0x34] sm:$0xf]  ;;  %v1265_v33 = vld [vmem:[#allocation5 + $0x3c] sm:$0xf0] }
  0x92   :  { %v69_v36 = vpack.c.bf16 %v68_v35, %v68_v35  ;;  %vm207_vm10 = vcmp.eq.s32.totalorder %v197_v53, %v176_v25  ;;  %v1275_v25 = vld [vmem:[#allocation5 + $0x48] sm:$0xf]  ;;  %v1763_v35 = vor.u32 %v1360_v32, %v1265_v33  ;;  %v1239_v53 = vld [vmem:[#allocation5] sm:$0xf] }
  0x93   :  { %v1210_v54 = vsel %vm207_vm10, 1.0, %v1586_v28  ;;  %v1283_v28 = vld [vmem:[#allocation5 + $0x50] sm:$0xf]  ;;  %v1757_v30 = vor.u32 %v1364_v27, %v1275_v25  ;;  %v1789_v63 = vor.u32 %v1355_v56, %v1239_v53 }
  0x94   :  { %1202 = vmatmul.msk.bf16.vlgmr.msra.gmra.mxu0 %vm106_vm4, %v69_v36  ;;  %v228_v55 = vpack.c.bf16 %v1211_v52, %v1210_v54  ;;  %v1759_v31 = vor.u32 %v1365_v29, %v1283_v28  ;;  %v1361_v36 = vld [vmem:[#allocation5 + $0x38] sm:$0xf0]  ;;  %549 = vmatpush.bf16.msrb.mxu1 %v1763_v35  ;;  %v1778_v52 = vor.u32 %v1359_v48, %v1259_v47  ;;  %v1354_v54 = vld [vmem:[#allocation5 + $0x4] sm:$0xf] }
  0x95   :  { %535 = vmatpush.bf16.msrb.mxu0 %v1757_v30  ;;  %622 = vmatpush.bf16.msrb.mxu3 %v1757_v30 }
  0x96   :  { %561 = vmatpush.bf16.msrb.mxu2 %v1759_v31 }
  0x98   :  { %550 = vmatpush.bf16.msrb.mxu1 %v1772_v49 }
  0x9a   :  { %562 = vmatpush.bf16.msrb.mxu2 %v1768_v40 }
  0x9d   :  { %1225 = vmatmul.msk.bf16.gmra.mxu1 %vm249_vm2, %v226_v39  ;;  %1229 = vmatmul.msk.bf16.gmra.mxu2 %vm249_vm2, %v226_v39 }
  0x9e   :  { %1233 = vmatmul.msk.bf16.gmra.mxu3 %vm249_vm2, %v226_v39  ;;  %v1766_v39 = vor.u32 %v1361_v36, %v1263_v34  ;;  %563 = vmatpush.bf16.msrb.mxu2 %v1778_v52 }
  0xa0   :  { %536 = vmatpush.bf16.msrb.mxu0 %v1766_v39  ;;  %623 = vmatpush.bf16.msrb.mxu3 %v1766_v39 }
  0xa2   :  { %564 = vmatpush.bf16.msrb.mxu2 %v1791_v1 }
  0xa4   :  { %537 = vmatpush.bf16.msrb.mxu0 %v1776_v51  ;;  %624 = vmatpush.bf16.msrb.mxu3 %v1776_v51 }
  0xa6   :  { %705 = vmatpush.bf16.msra.mxu2 %v1727_v0 }
  0xa8   :  { %538 = vmatpush.bf16.msrb.mxu0 %v1789_v63  ;;  %625 = vmatpush.bf16.msrb.mxu3 %v1789_v63 }
  0xaa   :  { %706 = vmatpush.bf16.msra.mxu2 %v1733_v7 }
  0xac   :  { %631 = vmatpush.bf16.msra.mxu0 %v1709_v44  ;;  %718 = vmatpush.bf16.msra.mxu3 %v1709_v44 }
  0xad   :  { %1226 = vmatmul.msk.bf16.gmra.mxu1 %vm249_vm2, %v227_v50  ;;  %1230 = vmatmul.msk.bf16.gmra.mxu2 %vm249_vm2, %v227_v50 }
  0xae   :  { %1234 = vmatmul.msk.bf16.gmra.mxu3 %vm249_vm2, %v227_v50  ;;  %707 = vmatpush.bf16.msra.mxu2 %v1740_v13 }
  0xb0   :  { %632 = vmatpush.bf16.msra.mxu0 %v1712_v46  ;;  %719 = vmatpush.bf16.msra.mxu3 %v1712_v46 }
  0xb2   :  { %708 = vmatpush.bf16.msra.mxu2 %v1747_v21 }
  0xb4   :  { %633 = vmatpush.bf16.msra.mxu0 %v1723_v61  ;;  %720 = vmatpush.bf16.msra.mxu3 %v1723_v61 }
  0xb6   :  { %709 = vmatpush.bf16.msra.mxu2 %v1757_v30 }
  0xb8   :  { %634 = vmatpush.bf16.msra.mxu0 %v1745_v17  ;;  %721 = vmatpush.bf16.msra.mxu3 %v1745_v17 }
  0xba   :  { %710 = vmatpush.bf16.msra.mxu2 %v1766_v39 }
  0xbc   :  { %635 = vmatpush.bf16.msra.mxu0 %v1754_v26  ;;  %722 = vmatpush.bf16.msra.mxu3 %v1754_v26 }
  0xbd   :  { %1227 = vmatmul.msk.bf16.gmra.mxu1 %vm249_vm2, %v228_v55  ;;  %1231 = vmatmul.msk.bf16.gmra.mxu2 %vm249_vm2, %v228_v55 }
  0xbe   :  { %1235 = vmatmul.msk.bf16.gmra.mxu3 %vm249_vm2, %v228_v55  ;;  %v1241_v55 = vld [vmem:[#allocation5 + $0xc] sm:$0xf0]  ;;  %711 = vmatpush.bf16.msra.mxu2 %v1776_v51 }
  0xbf   :  { %v1782_v60 = vor.u32 %v1354_v54, %v1241_v55 }
  0xc0   :  { %636 = vmatpush.bf16.msra.mxu0 %v1763_v35  ;;  %723 = vmatpush.bf16.msra.mxu3 %v1763_v35 }
  0xc1   :  { %551 = vmatpush.bf16.msrb.mxu1 %v1782_v60 }
  0xc2   :  { %712 = vmatpush.bf16.msra.mxu2 %v1789_v63 }
  0xc4   :  { %637 = vmatpush.bf16.msra.mxu0 %v1772_v49  ;;  %724 = vmatpush.bf16.msra.mxu3 %v1772_v49 }
  0xc5   :  { %644 = vmatpush.bf16.msra.mxu1 %v1721_v59 }
  0xc8   :  { %638 = vmatpush.bf16.msra.mxu0 %v1782_v60  ;;  %725 = vmatpush.bf16.msra.mxu3 %v1782_v60 }
  0xc9   :  { %645 = vmatpush.bf16.msra.mxu1 %v1731_v4 }
  0xcd   :  { %646 = vmatpush.bf16.msra.mxu1 %v1738_v11 }
  0xd1   :  { %647 = vmatpush.bf16.msra.mxu1 %v1749_v22 }
  0xd5   :  { %648 = vmatpush.bf16.msra.mxu1 %v1759_v31 }
  0xd9   :  { %649 = vmatpush.bf16.msra.mxu1 %v1768_v40 }
  0xdd   :  { %650 = vmatpush.bf16.msra.mxu1 %v1778_v52 }
  0xe1   :  { %651 = vmatpush.bf16.msra.mxu1 %v1791_v1 }
 0x10a   :  { %v271_v50 = vpop.f32.mrf.mxu1 }
 0x110   :  { %v299_v2 = vpop.f32.mrf.mxu2 }
 0x111   :  { %v1236_v3 = vmul.f32 -1.442695, %v299_v2  ;;  %v119_v6 = vpop.f32.mrf.mxu0  ;;  %v328_v19 = vpop.f32.mrf.mxu3 }
 0x112   :  { %v1795_v8 = vadd.f32 %v1391_v62, %v119_v6  ;;  %v272_v42 = vpop.f32.mrf.mxu1 }
 0x113   :  { %1392 = vpow2.f32 %v1236_v3 }
 0x114   :  { %1394 = vtanh.f32 %v1795_v8  ;;  %v1203_v37 = vmul.f32 -1.442695, %v1795_v8 }
 0x118   :  { %v301_v45 = vpop.f32.mrf.mxu2 }
 0x119   :  { %v1393_v9 = vpop.eup %1392  ;;  %v121_v10 = vpop.f32.mrf.mxu0 }
 0x11a   :  { %v1395_v12 = vpop.eup %1394  ;;  %v383_v14 = vadd.f32 1.0, %v1393_v9  ;;  %v1863_v47 = vpop.f32.mrf.mxu1 }
 0x11b   :  { %145 = vrot.lane.b32.xlu0 %v1395_v12, %s1587_s4 }
 0x11c   :  { %1396 = vrcp.f32 %v383_v14  ;;  %v395_v20 = vand.u32 2147483648, %v383_v14  ;;  %v393_v24 = vand.u32 2147483647, %v383_v14  ;;  %vm389_vm12 = vweird.f32 %v383_v14 }
 0x11d   :  { %1398 = vtanh.f32 %v328_v19 }
 0x11e   :  { %v396_v27 = vor.u32 1.1754944e-38, %v395_v20  ;;  %vm394_vm14 = vcmp.eq.f32.partialorder %v393_v24, 8.507059e+37  ;;  %1400 = vpow2.f32 %v1203_v37 }
 0x120   :  { %v1865_v53 = vpop.f32.mrf.mxu2 }
 0x122   :  { %v1397_v15 = vpop.eup %1396  ;;  %v1867_v54 = vpop.f32.mrf.mxu1 }
 0x123   :  { %v385_v16 = vmul.f32 %v1397_v15, %v383_v14  ;;  %vm390_vm11 = vweird.f32 %v1397_v15  ;;  %v1399_v33 = vpop.eup %1398 }
 0x124   :  { %vm391_vm13 = vmor %vm389_vm12, %vm390_vm11  ;;  %v1401_v38 = vpop.eup %1400 }
 0x125   :  { %v386_v18 = vsub.f32 1.0, %v385_v16  ;;  %v126_v41 = vadd.f32 1.0, %v1401_v38 }
 0x127   :  { %v387_v23 = vmul.f32 %v1397_v15, %v386_v18  ;;  %1402 = vrcp.f32 %v126_v41  ;;  %vm132_vm15 = vweird.f32 %v126_v41  ;;  %v138_v56 = vand.u32 2147483648, %v126_v41 }
 0x128   :  { %v136_v58 = vand.u32 2147483647, %v126_v41  ;;  %v1869_v62 = vpop.f32.mrf.mxu2 }
 0x129   :  { %v388_v25 = vadd.f32 %v1397_v15, %v387_v23  ;;  %v139_v2 = vor.u32 1.1754944e-38, %v138_v56 }
 0x12a   :  { %vm137_vm2 = vcmp.eq.f32.partialorder %v136_v58, 8.507059e+37  ;;  %v1871_v6 = vpop.f32.mrf.mxu1 }
 0x12b   :  { %v392_v28 = vsel %vm391_vm13, %v1397_v15, %v388_v25 }
 0x12c   :  { %v397_v29 = vsel %vm394_vm14, %v396_v27, %v392_v28 }
 0x12d   :  { %v400_v32 = vsub.f32 1.0, %v397_v29  ;;  %v1403_v43 = vpop.eup %1402 }
 0x12e   :  { %v128_v48 = vmul.f32 %v1403_v43, %v126_v41  ;;  %vm133_vm0 = vweird.f32 %v1403_v43 }
 0x12f   :  { %v1830_v34 = vmul.f32 %v1399_v33, %v400_v32  ;;  %vm134_vm1 = vmor %vm132_vm15, %vm133_vm0 }
 0x130   :  { %v129_v50 = vsub.f32 1.0, %v128_v48  ;;  %v1877_v12 = vpop.f32.mrf.mxu2 }
 0x131   :  { %v402_v36 = vpack.c.bf16 %v1830_v34, %v1830_v34 }
 0x132   :  { %v130_v55 = vmul.f32 %v1403_v43, %v129_v50  ;;  %v1879_v14 = vpop.f32.mrf.mxu1 }
 0x133   :  { %539 = vmatmul.bf16.vlgmr.msrb.gmra.mxu0 %v402_v36  ;;  %552 = vmatmul.bf16.vlgmr.msrb.gmra.mxu1 %v402_v36 }
 0x134   :  { %565 = vmatmul.bf16.vlgmr.msrb.gmra.mxu2 %v402_v36  ;;  %731 = vmatpush.bf16.msrb.mxu0 %v1721_v59  ;;  %v131_v57 = vadd.f32 %v1403_v43, %v130_v55 }
 0x135   :  { %792 = vmatpush.bf16.msrb.mxu1 %v1727_v0  ;;  %805 = vmatpush.bf16.msrb.mxu2 %v1709_v44 }
 0x136   :  { %v135_v3 = vsel %vm134_vm1, %v1403_v43, %v131_v57 }
 0x137   :  { %v1873_v8 = vsel %vm137_vm2, %v139_v2, %v135_v3 }
 0x138   :  { %732 = vmatpush.bf16.msrb.mxu0 %v1731_v4  ;;  %v1881_v15 = vpop.f32.mrf.mxu2 }
 0x139   :  { %793 = vmatpush.bf16.msrb.mxu1 %v1733_v7  ;;  %806 = vmatpush.bf16.msrb.mxu2 %v1712_v46 }
 0x13a   :  { %v1883_v16 = vpop.f32.mrf.mxu1 }
 0x13c   :  { %733 = vmatpush.bf16.msrb.mxu0 %v1738_v11 }
 0x13d   :  { %794 = vmatpush.bf16.msrb.mxu1 %v1740_v13  ;;  %807 = vmatpush.bf16.msrb.mxu2 %v1723_v61 }
 0x140   :  { %734 = vmatpush.bf16.msrb.mxu0 %v1749_v22  ;;  %v1885_v18 = vpop.f32.mrf.mxu2 }
 0x141   :  { %795 = vmatpush.bf16.msrb.mxu1 %v1747_v21  ;;  %808 = vmatpush.bf16.msrb.mxu2 %v1745_v17 }
 0x142   :  { %v1887_v19 = vpop.f32.mrf.mxu1 }
 0x144   :  { %735 = vmatpush.bf16.msrb.mxu0 %v1759_v31 }
 0x145   :  { %796 = vmatpush.bf16.msrb.mxu1 %v1757_v30  ;;  %809 = vmatpush.bf16.msrb.mxu2 %v1754_v26 }
 0x148   :  { %736 = vmatpush.bf16.msrb.mxu0 %v1768_v40  ;;  %v1889_v20 = vpop.f32.mrf.mxu2 }
 0x149   :  { %797 = vmatpush.bf16.msrb.mxu1 %v1766_v39  ;;  %810 = vmatpush.bf16.msrb.mxu2 %v1763_v35 }
 0x14c   :  { %737 = vmatpush.bf16.msrb.mxu0 %v1778_v52 }
 0x14d   :  { %798 = vmatpush.bf16.msrb.mxu1 %v1776_v51  ;;  %811 = vmatpush.bf16.msrb.mxu2 %v1772_v49 }
 0x150   :  { %738 = vmatpush.bf16.msrb.mxu0 %v1791_v1 }
 0x151   :  { %799 = vmatpush.bf16.msrb.mxu1 %v1789_v63  ;;  %812 = vmatpush.bf16.msrb.mxu2 %v1782_v60 }
 0x18d   :  { %v146_v9 = vpop.permute.xlu0 %145 }
 0x18e   :  { %v148_v10 = vmul.f32 %v146_v9, %v1873_v8 }
 0x190   :  { %150 = vrot.lane.b32.xlu1 %v148_v10, %s1585_s23 }
 0x1b0   :  { %v540_v23 = vpop.f32.mrf.mxu0  ;;  %v553_v24 = vpop.f32.mrf.mxu1 }
 0x1b1   :  { %v570_v25 = vadd.f32 %v540_v23, %v272_v42  ;;  %v590_v27 = vadd.f32 %v553_v24, %v301_v45 }
 0x1b3   :  { %v1333_v28 = vmul.f32 -1.442695, %v570_v25  ;;  %v1334_v29 = vmul.f32 -1.442695, %v590_v27 }
 0x1b5   :  { %1404 = vpow2.f32 %v1333_v28 }
 0x1b6   :  { %1406 = vpow2.f32 %v1334_v29 }
 0x1b7   :  { %v566_v32 = vpop.f32.mrf.mxu2 }
 0x1b8   :  { %v542_v33 = vpop.f32.mrf.mxu0  ;;  %v555_v36 = vpop.f32.mrf.mxu1 }
 0x1b9   :  { %v330_v33 = vpop.f32.mrf.mxu3 }
 0x1bb   :  { %v1405_v37 = vpop.eup %1404 }
 0x1bc   :  { %v1407_v38 = vpop.eup %1406  ;;  %v574_v41 = vadd.f32 1.0, %v1405_v37 }
 0x1bd   :  { %v594_v43 = vadd.f32 1.0, %v1407_v38 }
 0x1be   :  { %1408 = vrcp.f32 %v574_v41  ;;  %v586_v58 = vand.u32 2147483648, %v574_v41  ;;  %v584_v3 = vand.u32 2147483647, %v574_v41  ;;  %vm580_vm5 = vweird.f32 %v574_v41 }
 0x1bf   :  { %1410 = vrcp.f32 %v594_v43  ;;  %v568_v48 = vpop.f32.mrf.mxu2  ;;  %v606_v29 = vand.u32 2147483648, %v594_v43  ;;  %vm600_vm9 = vweird.f32 %v594_v43  ;;  %v604_v36 = vand.u32 2147483647, %v594_v43 }
 0x1c0   :  { %v587_v23 = vor.u32 1.1754944e-38, %v586_v58  ;;  %vm585_vm7 = vcmp.eq.f32.partialorder %v584_v3, 8.507059e+37 }
 0x1c1   :  { %v607_v48 = vor.u32 1.1754944e-38, %v606_v29  ;;  %vm605_vm11 = vcmp.eq.f32.partialorder %v604_v36, 8.507059e+37 }
 0x1c4   :  { %v1409_v50 = vpop.eup %1408 }
 0x1c5   :  { %v1411_v55 = vpop.eup %1410  ;;  %v576_v56 = vmul.f32 %v1409_v50, %v574_v41  ;;  %vm581_vm4 = vweird.f32 %v1409_v50 }
 0x1c6   :  { %v596_v57 = vmul.f32 %v1411_v55, %v594_v43  ;;  %vm582_vm6 = vmor %vm580_vm5, %vm581_vm4  ;;  %vm601_vm8 = vweird.f32 %v1411_v55  ;;  %vm165_vm5 = vcmask 517120  }
 0x1c7   :  { %v577_v42 = vsub.f32 1.0, %v576_v56  ;;  %vm602_vm10 = vmor %vm600_vm9, %vm601_vm8 }
 0x1c8   :  { %v597_v45 = vsub.f32 1.0, %v596_v57 }
 0x1c9   :  { %v578_v2 = vmul.f32 %v1409_v50, %v577_v42 }
 0x1ca   :  { %v598_v9 = vmul.f32 %v1411_v55, %v597_v45 }
 0x1cb   :  { %v579_v10 = vadd.f32 %v1409_v50, %v578_v2  ;;  %v333_v2 = vpop.f32.mrf.mxu3 }
 0x1cc   :  { %v599_v27 = vadd.f32 %v1411_v55, %v598_v9 }
 0x1cd   :  { %v583_v24 = vsel %vm582_vm6, %v1409_v50, %v579_v10 }
 0x1ce   :  { %v588_v25 = vsel %vm585_vm7, %v587_v23, %v583_v24  ;;  %v603_v38 = vsel %vm602_vm10, %v1411_v55, %v599_v27 }
 0x1cf   :  { %v610_v28 = vmul.f32 %v588_v25, %v566_v32  ;;  %v608_v56 = vsel %vm605_vm11, %v607_v48, %v603_v38 }
 0x1d0   :  { %v613_v41 = vsub.f32 1.0, %v608_v56  ;;  %v615_v50 = vmul.f32 %v608_v56, %v1830_v34  ;;  %v143_v34 = vmul.f32 %v1873_v8, %v1653_v5 }
 0x1d1   :  { %v611_v37 = vadd.f32 %v610_v28, %v330_v33 }
 0x1d3   :  { %1412 = vtanh.f32 %v611_v37  ;;  %v1926_v3 = vpop.f32.mrf.mxu3 }
 0x1d9   :  { %v1413_v57 = vpop.eup %1412 }
 0x1da   :  { %v614_v42 = vmul.f32 %v1413_v57, %v613_v41 }
 0x1db   :  { %v1928_v9 = vpop.f32.mrf.mxu3 }
 0x1dc   :  { %v1892_v45 = vadd.f32 %v615_v50, %v614_v42 }
 0x1de   :  { %v617_v32 = vpack.c.bf16 %v1892_v45, %v1892_v45 }
 0x1e0   :  { %626 = vmatmul.bf16.vlgmr.msrb.gmra.mxu3 %v617_v32  ;;  %639 = vmatmul.bf16.vlgmr.msra.gmra.mxu0 %v617_v32 }
 0x1e1   :  { %652 = vmatmul.bf16.vlgmr.msra.gmra.mxu1 %v617_v32  ;;  %818 = vmatpush.bf16.msrb.mxu3 %v1721_v59 }
 0x1e2   :  { %879 = vmatpush.bf16.msra.mxu0 %v1727_v0  ;;  %892 = vmatpush.bf16.msra.mxu1 %v1709_v44 }
 0x1e3   :  { %v1930_v10 = vpop.f32.mrf.mxu3 }
 0x1e5   :  { %819 = vmatpush.bf16.msrb.mxu3 %v1731_v4 }
 0x1e6   :  { %880 = vmatpush.bf16.msra.mxu0 %v1733_v7  ;;  %893 = vmatpush.bf16.msra.mxu1 %v1712_v46 }
 0x1e9   :  { %820 = vmatpush.bf16.msrb.mxu3 %v1738_v11 }
 0x1ea   :  { %881 = vmatpush.bf16.msra.mxu0 %v1740_v13  ;;  %894 = vmatpush.bf16.msra.mxu1 %v1723_v61 }
 0x1eb   :  { %v1932_v23 = vpop.f32.mrf.mxu3 }
 0x1ed   :  { %821 = vmatpush.bf16.msrb.mxu3 %v1749_v22 }
 0x1ee   :  { %882 = vmatpush.bf16.msra.mxu0 %v1747_v21  ;;  %895 = vmatpush.bf16.msra.mxu1 %v1745_v17 }
 0x1f1   :  { %822 = vmatpush.bf16.msrb.mxu3 %v1759_v31 }
 0x1f2   :  { %883 = vmatpush.bf16.msra.mxu0 %v1757_v30  ;;  %896 = vmatpush.bf16.msra.mxu1 %v1754_v26 }
 0x1f3   :  { %v1934_v24 = vpop.f32.mrf.mxu3 }
 0x1f5   :  { %823 = vmatpush.bf16.msrb.mxu3 %v1768_v40 }
 0x1f6   :  { %884 = vmatpush.bf16.msra.mxu0 %v1766_v39  ;;  %897 = vmatpush.bf16.msra.mxu1 %v1763_v35 }
 0x1f9   :  { %824 = vmatpush.bf16.msrb.mxu3 %v1778_v52 }
 0x1fa   :  { %885 = vmatpush.bf16.msra.mxu0 %v1776_v51  ;;  %898 = vmatpush.bf16.msra.mxu1 %v1772_v49 }
 0x1fd   :  { %825 = vmatpush.bf16.msrb.mxu3 %v1791_v1 }
 0x1fe   :  { %886 = vmatpush.bf16.msra.mxu0 %v1789_v63  ;;  %899 = vmatpush.bf16.msra.mxu1 %v1782_v60 }
 0x202   :  { %v151_v43 = vpop.permute.xlu1 %150 }
 0x203   :  { %v1922_v55 = vadd.f32 %v151_v43, %v143_v34 }
 0x205   :  { %1414 = vtanh.f32 %v1922_v55 }
 0x20b   :  { %v1415_v58 = vpop.eup %1414 }
 0x20c   :  { %156 = vrot.lane.b32.xlu2 %v1415_v58, %s1587_s4 }
 0x25d   :  { %v640_v5 = vpop.f32.mrf.mxu0 }
 0x25e   :  { %v677_v25 = vadd.f32 %v640_v5, %v1865_v53  ;;  %v653_v27 = vpop.f32.mrf.mxu1 }
 0x260   :  { %v1336_v28 = vmul.f32 -1.442695, %v677_v25 }
 0x262   :  { %1416 = vpow2.f32 %v1336_v28 }
 0x263   :  { %v627_v29 = vpop.f32.mrf.mxu3 }
 0x264   :  { %v657_v33 = vadd.f32 %v627_v29, %v1863_v47 }
 0x265   :  { %v642_v36 = vpop.f32.mrf.mxu0 }
 0x266   :  { %v1335_v37 = vmul.f32 -1.442695, %v657_v33  ;;  %v655_v38 = vpop.f32.mrf.mxu1  ;;  %v157_v48 = vpop.permute.xlu2 %156 }
 0x267   :  { %v159_v56 = vmul.f32 %v157_v48, %v1873_v8 }
 0x268   :  { %v1417_v41 = vpop.eup %1416  ;;  %1418 = vpow2.f32 %v1335_v37 }
 0x269   :  { %v681_v57 = vadd.f32 1.0, %v1417_v41  ;;  %161 = vrot.lane.b32.xlu1 %v159_v56, %s1585_s23 }
 0x26b   :  { %v629_v42 = vpop.f32.mrf.mxu3  ;;  %1420 = vrcp.f32 %v681_v57  ;;  %v693_v56 = vand.u32 2147483648, %v681_v57  ;;  %vm687_vm1 = vweird.f32 %v681_v57 }
 0x26c   :  { %v691_v42 = vand.u32 2147483647, %v681_v57 }
 0x26e   :  { %v1419_v53 = vpop.eup %1418  ;;  %vm692_vm4 = vcmp.eq.f32.partialorder %v691_v42, 8.507059e+37 }
 0x26f   :  { %v661_v50 = vadd.f32 1.0, %v1419_v53 }
 0x271   :  { %1422 = vrcp.f32 %v661_v50  ;;  %v1421_v32 = vpop.eup %1420  ;;  %v673_v25 = vand.u32 2147483648, %v661_v50  ;;  %v671_v8 = vand.u32 2147483647, %v661_v50  ;;  %vm667_vm13 = vweird.f32 %v661_v50 }
 0x272   :  { %v683_v34 = vmul.f32 %v1421_v32, %v681_v57  ;;  %vm688_vm0 = vweird.f32 %v1421_v32 }
 0x273   :  { %v674_v36 = vor.u32 1.1754944e-38, %v673_v25  ;;  %vm672_vm15 = vcmp.eq.f32.partialorder %v671_v8, 8.507059e+37  ;;  %vm689_vm2 = vmor %vm687_vm1, %vm688_vm0 }
 0x274   :  { %v684_v58 = vsub.f32 1.0, %v683_v34 }
 0x276   :  { %v685_v29 = vmul.f32 %v1421_v32, %v684_v58 }
 0x277   :  { %v1423_v43 = vpop.eup %1422 }
 0x278   :  { %v663_v47 = vmul.f32 %v1423_v43, %v661_v50  ;;  %vm668_vm12 = vweird.f32 %v1423_v43  ;;  %v686_v48 = vadd.f32 %v1421_v32, %v685_v29 }
 0x279   :  { %vm669_vm14 = vmor %vm667_vm13, %vm668_vm12 }
 0x27a   :  { %v664_v5 = vsub.f32 1.0, %v663_v47  ;;  %v690_v34 = vsel %vm689_vm2, %v1421_v32, %v686_v48  ;;  %v694_v47 = vor.u32 1.1754944e-38, %v693_v56 }
 0x27c   :  { %v665_v28 = vmul.f32 %v1423_v43, %v664_v5  ;;  %v695_v58 = vsel %vm692_vm4, %v694_v47, %v690_v34 }
 0x27d   :  { %v700_v5 = vsub.f32 1.0, %v695_v58 }
 0x27e   :  { %v666_v33 = vadd.f32 %v1423_v43, %v665_v28 }
 0x280   :  { %v670_v37 = vsel %vm669_vm14, %v1423_v43, %v666_v33  ;;  %v702_v43 = vmul.f32 %v695_v58, %v1892_v45 }
 0x281   :  { %v675_v38 = vsel %vm672_vm15, %v674_v36, %v670_v37 }
 0x282   :  { %v697_v41 = vmul.f32 %v675_v38, %v653_v27 }
 0x284   :  { %v698_v53 = vadd.f32 %v697_v41, %v333_v2 }
 0x286   :  { %1424 = vtanh.f32 %v698_v53 }
 0x28c   :  { %v1425_v50 = vpop.eup %1424 }
 0x28d   :  { %v701_v28 = vmul.f32 %v1425_v50, %v700_v5 }
 0x28f   :  { %v1941_v25 = vadd.f32 %v702_v43, %v701_v28 }
 0x291   :  { %v704_v8 = vpack.c.bf16 %v1941_v25, %v1941_v25 }
 0x293   :  { %713 = vmatmul.bf16.vlgmr.msra.gmra.mxu2 %v704_v8  ;;  %726 = vmatmul.bf16.vlgmr.msra.gmra.mxu3 %v704_v8 }
 0x294   :  { %739 = vmatmul.bf16.vlgmr.msrb.gmra.mxu0 %v704_v8  ;;  %905 = vmatpush.bf16.msra.mxu2 %v1721_v59 }
 0x295   :  { %966 = vmatpush.bf16.msra.mxu3 %v1727_v0  ;;  %979 = vmatpush.bf16.msrb.mxu0 %v1709_v44 }
 0x298   :  { %906 = vmatpush.bf16.msra.mxu2 %v1731_v4 }
 0x299   :  { %967 = vmatpush.bf16.msra.mxu3 %v1733_v7  ;;  %980 = vmatpush.bf16.msrb.mxu0 %v1712_v46 }
 0x29c   :  { %907 = vmatpush.bf16.msra.mxu2 %v1738_v11 }
 0x29d   :  { %968 = vmatpush.bf16.msra.mxu3 %v1740_v13  ;;  %981 = vmatpush.bf16.msrb.mxu0 %v1723_v61 }
 0x2a0   :  { %908 = vmatpush.bf16.msra.mxu2 %v1749_v22 }
 0x2a1   :  { %969 = vmatpush.bf16.msra.mxu3 %v1747_v21  ;;  %982 = vmatpush.bf16.msrb.mxu0 %v1745_v17 }
 0x2a4   :  { %909 = vmatpush.bf16.msra.mxu2 %v1759_v31 }
 0x2a5   :  { %970 = vmatpush.bf16.msra.mxu3 %v1757_v30  ;;  %983 = vmatpush.bf16.msrb.mxu0 %v1754_v26 }
 0x2a8   :  { %910 = vmatpush.bf16.msra.mxu2 %v1768_v40 }
 0x2a9   :  { %971 = vmatpush.bf16.msra.mxu3 %v1766_v39  ;;  %984 = vmatpush.bf16.msrb.mxu0 %v1763_v35 }
 0x2ac   :  { %911 = vmatpush.bf16.msra.mxu2 %v1778_v52 }
 0x2ad   :  { %972 = vmatpush.bf16.msra.mxu3 %v1776_v51  ;;  %985 = vmatpush.bf16.msrb.mxu0 %v1772_v49 }
 0x2b0   :  { %912 = vmatpush.bf16.msra.mxu2 %v1791_v1 }
 0x2b1   :  { %973 = vmatpush.bf16.msra.mxu3 %v1789_v63  ;;  %986 = vmatpush.bf16.msrb.mxu0 %v1782_v60 }
 0x2db   :  { %v1969_v45 = vpop.permute.xlu1 %161 }
 0x2dc   :  { %v164_v2 = vsel %vm67_vm3, %v1969_v45, %v1922_v55 }
 0x2dd   :  { %166 = vst.msk [vmem:[#allocation8] sm:$0x3] %vm165_vm5, %v164_v2 }
 0x2de   :  { %1173 = dma.vmem_to_hbm [thread:$0]  %s1169_s30, 32, %s1171_s11, [#allocation9]  }
 0x311   :  { %v740_v27 = vpop.f32.mrf.mxu0 }
 0x316   :  { %v714_v57 = vpop.f32.mrf.mxu2  ;;  %v727_v32 = vpop.f32.mrf.mxu3 }
 0x317   :  { %v744_v29 = vadd.f32 %v714_v57, %v1867_v54  ;;  %v764_v33 = vadd.f32 %v727_v32, %v1869_v62 }
 0x319   :  { %v1337_v36 = vmul.f32 -1.442695, %v744_v29  ;;  %v1338_v37 = vmul.f32 -1.442695, %v764_v33  ;;  %v742_v38 = vpop.f32.mrf.mxu0 }
 0x31b   :  { %1426 = vpow2.f32 %v1337_v36 }
 0x31c   :  { %1428 = vpow2.f32 %v1338_v37 }
 0x31e   :  { %v716_v48 = vpop.f32.mrf.mxu2  ;;  %v729_v56 = vpop.f32.mrf.mxu3 }
 0x321   :  { %v1427_v41 = vpop.eup %1426 }
 0x322   :  { %v1429_v42 = vpop.eup %1428  ;;  %v748_v53 = vadd.f32 1.0, %v1427_v41 }
 0x323   :  { %v768_v34 = vadd.f32 1.0, %v1429_v42 }
 0x324   :  { %1430 = vrcp.f32 %v748_v53  ;;  %v760_v50 = vand.u32 2147483648, %v748_v53  ;;  %v758_v43 = vand.u32 2147483647, %v748_v53  ;;  %vm754_vm7 = vweird.f32 %v748_v53 }
 0x325   :  { %1432 = vrcp.f32 %v768_v34  ;;  %v780_v37 = vand.u32 2147483648, %v768_v34  ;;  %vm774_vm11 = vweird.f32 %v768_v34  ;;  %v778_v38 = vand.u32 2147483647, %v768_v34 }
 0x326   :  { %v761_v57 = vor.u32 1.1754944e-38, %v760_v50  ;;  %vm759_vm9 = vcmp.eq.f32.partialorder %v758_v43, 8.507059e+37 }
 0x327   :  { %v781_v41 = vor.u32 1.1754944e-38, %v780_v37  ;;  %vm779_vm13 = vcmp.eq.f32.partialorder %v778_v38, 8.507059e+37 }
 0x32a   :  { %v1431_v55 = vpop.eup %1430 }
 0x32b   :  { %v1433_v47 = vpop.eup %1432  ;;  %v750_v58 = vmul.f32 %v1431_v55, %v748_v53  ;;  %vm755_vm6 = vweird.f32 %v1431_v55 }
 0x32c   :  { %v770_v5 = vmul.f32 %v1433_v47, %v768_v34  ;;  %vm756_vm8 = vmor %vm754_vm7, %vm755_vm6  ;;  %vm775_vm10 = vweird.f32 %v1433_v47 }
 0x32d   :  { %v751_v54 = vsub.f32 1.0, %v750_v58  ;;  %vm776_vm12 = vmor %vm774_vm11, %vm775_vm10 }
 0x32e   :  { %v771_v62 = vsub.f32 1.0, %v770_v5 }
 0x32f   :  { %v752_v28 = vmul.f32 %v1431_v55, %v751_v54 }
 0x330   :  { %v772_v8 = vmul.f32 %v1433_v47, %v771_v62 }
 0x331   :  { %v753_v2 = vadd.f32 %v1431_v55, %v752_v28 }
 0x332   :  { %v773_v33 = vadd.f32 %v1433_v47, %v772_v8 }
 0x333   :  { %v757_v32 = vsel %vm756_vm8, %v1431_v55, %v753_v2 }
 0x334   :  { %v762_v29 = vsel %vm759_vm9, %v761_v57, %v757_v32  ;;  %v777_v56 = vsel %vm776_vm12, %v1433_v47, %v773_v33 }
 0x335   :  { %v784_v36 = vmul.f32 %v762_v29, %v740_v27  ;;  %v782_v42 = vsel %vm779_vm13, %v781_v41, %v777_v56 }
 0x336   :  { %v787_v53 = vsub.f32 1.0, %v782_v42  ;;  %v789_v55 = vmul.f32 %v782_v42, %v1941_v25 }
 0x337   :  { %v785_v48 = vadd.f32 %v784_v36, %v1926_v3 }
 0x339   :  { %1434 = vtanh.f32 %v785_v48 }
 0x33f   :  { %v1435_v58 = vpop.eup %1434 }
 0x340   :  { %v788_v5 = vmul.f32 %v1435_v58, %v787_v53 }
 0x342   :  { %v1978_v54 = vadd.f32 %v789_v55, %v788_v5 }
 0x344   :  { %v791_v27 = vpack.c.bf16 %v1978_v54, %v1978_v54 }
 0x346   :  { %800 = vmatmul.bf16.vlgmr.msrb.gmra.mxu1 %v791_v27  ;;  %813 = vmatmul.bf16.vlgmr.msrb.gmra.mxu2 %v791_v27 }
 0x347   :  { %826 = vmatmul.bf16.vlgmr.msrb.gmra.mxu3 %v791_v27  ;;  %992 = vmatpush.bf16.msrb.mxu1 %v1721_v59 }
 0x348   :  { %1053 = vmatpush.bf16.msrb.mxu2 %v1727_v0  ;;  %1066 = vmatpush.bf16.msrb.mxu3 %v1709_v44 }
 0x34b   :  { %993 = vmatpush.bf16.msrb.mxu1 %v1731_v4 }
 0x34c   :  { %1054 = vmatpush.bf16.msrb.mxu2 %v1733_v7  ;;  %1067 = vmatpush.bf16.msrb.mxu3 %v1712_v46 }
 0x34f   :  { %994 = vmatpush.bf16.msrb.mxu1 %v1738_v11 }
 0x350   :  { %1055 = vmatpush.bf16.msrb.mxu2 %v1740_v13  ;;  %1068 = vmatpush.bf16.msrb.mxu3 %v1723_v61 }
 0x353   :  { %995 = vmatpush.bf16.msrb.mxu1 %v1749_v22 }
 0x354   :  { %1056 = vmatpush.bf16.msrb.mxu2 %v1747_v21  ;;  %1069 = vmatpush.bf16.msrb.mxu3 %v1745_v17 }
 0x357   :  { %996 = vmatpush.bf16.msrb.mxu1 %v1759_v31 }
 0x358   :  { %1057 = vmatpush.bf16.msrb.mxu2 %v1757_v30  ;;  %1070 = vmatpush.bf16.msrb.mxu3 %v1754_v26 }
 0x35b   :  { %997 = vmatpush.bf16.msrb.mxu1 %v1768_v40 }
 0x35c   :  { %1058 = vmatpush.bf16.msrb.mxu2 %v1766_v39  ;;  %1071 = vmatpush.bf16.msrb.mxu3 %v1763_v35 }
 0x35f   :  { %998 = vmatpush.bf16.msrb.mxu1 %v1778_v52 }
 0x360   :  { %1059 = vmatpush.bf16.msrb.mxu2 %v1776_v51  ;;  %1072 = vmatpush.bf16.msrb.mxu3 %v1772_v49 }
 0x363   :  { %999 = vmatpush.bf16.msrb.mxu1 %v1791_v1 }
 0x364   :  { %1060 = vmatpush.bf16.msrb.mxu2 %v1789_v63  ;;  %1073 = vmatpush.bf16.msrb.mxu3 %v1782_v60 }
 0x3c3   :  { %v801_v44 = vpop.f32.mrf.mxu1 }
 0x3c4   :  { %v831_v46 = vadd.f32 %v801_v44, %v1871_v6 }
 0x3c6   :  { %v1339_v61 = vmul.f32 -1.442695, %v831_v46 }
 0x3c8   :  { %1436 = vpow2.f32 %v1339_v61 }
 0x3c9   :  { %v814_v0 = vpop.f32.mrf.mxu2 }
 0x3ca   :  { %v851_v7 = vadd.f32 %v814_v0, %v1877_v12  ;;  %v827_v13 = vpop.f32.mrf.mxu3 }
 0x3cb   :  { %v803_v17 = vpop.f32.mrf.mxu1 }
 0x3cc   :  { %v1340_v21 = vmul.f32 -1.442695, %v851_v7 }
 0x3ce   :  { %v1437_v26 = vpop.eup %1436  ;;  %1438 = vpow2.f32 %v1340_v21 }
 0x3cf   :  { %v835_v30 = vadd.f32 1.0, %v1437_v26 }
 0x3d1   :  { %1440 = vrcp.f32 %v835_v30  ;;  %v816_v35 = vpop.f32.mrf.mxu2  ;;  %v847_v3 = vand.u32 2147483648, %v835_v30  ;;  %v845_v34 = vand.u32 2147483647, %v835_v30  ;;  %vm841_vm15 = vweird.f32 %v835_v30 }
 0x3d2   :  { %v829_v39 = vpop.f32.mrf.mxu3 }
 0x3d3   :  { %v848_v62 = vor.u32 1.1754944e-38, %v847_v3  ;;  %vm846_vm1 = vcmp.eq.f32.partialorder %v845_v34, 8.507059e+37 }
 0x3d4   :  { %v1439_v49 = vpop.eup %1438 }
 0x3d5   :  { %v855_v51 = vadd.f32 1.0, %v1439_v49 }
 0x3d7   :  { %v1441_v60 = vpop.eup %1440  ;;  %1442 = vrcp.f32 %v855_v51  ;;  %v867_v57 = vand.u32 2147483648, %v855_v51  ;;  %v865_v29 = vand.u32 2147483647, %v855_v51  ;;  %vm861_vm4 = vweird.f32 %v855_v51 }
 0x3d8   :  { %v837_v63 = vmul.f32 %v1441_v60, %v835_v30  ;;  %vm842_vm14 = vweird.f32 %v1441_v60 }
 0x3d9   :  { %vm843_vm0 = vmor %vm841_vm15, %vm842_vm14  ;;  %v868_v37 = vor.u32 1.1754944e-38, %v867_v57  ;;  %vm866_vm6 = vcmp.eq.f32.partialorder %v865_v29, 8.507059e+37 }
 0x3da   :  { %v838_v6 = vsub.f32 1.0, %v837_v63 }
 0x3dc   :  { %v839_v25 = vmul.f32 %v1441_v60, %v838_v6 }
 0x3dd   :  { %v1443_v12 = vpop.eup %1442 }
 0x3de   :  { %v857_v47 = vmul.f32 %v1443_v12, %v855_v51  ;;  %v840_v50 = vadd.f32 %v1441_v60, %v839_v25  ;;  %vm862_vm2 = vweird.f32 %v1443_v12 }
 0x3df   :  { %vm863_vm5 = vmor %vm861_vm4, %vm862_vm2 }
 0x3e0   :  { %v858_v28 = vsub.f32 1.0, %v857_v47  ;;  %v844_v43 = vsel %vm843_vm0, %v1441_v60, %v840_v50 }
 0x3e1   :  { %v849_v8 = vsel %vm846_vm1, %v848_v62, %v844_v43 }
 0x3e2   :  { %v859_v2 = vmul.f32 %v1443_v12, %v858_v28  ;;  %v871_v32 = vmul.f32 %v849_v8, %v827_v13 }
 0x3e4   :  { %v860_v33 = vadd.f32 %v1443_v12, %v859_v2  ;;  %v872_v36 = vadd.f32 %v871_v32, %v1928_v9 }
 0x3e6   :  { %v864_v38 = vsel %vm863_vm5, %v1443_v12, %v860_v33  ;;  %1444 = vtanh.f32 %v872_v36 }
 0x3e7   :  { %v869_v48 = vsel %vm866_vm6, %v868_v37, %v864_v38 }
 0x3e8   :  { %v874_v56 = vsub.f32 1.0, %v869_v48  ;;  %v876_v53 = vmul.f32 %v869_v48, %v1978_v54 }
 0x3ec   :  { %v1445_v41 = vpop.eup %1444 }
 0x3ed   :  { %v875_v42 = vmul.f32 %v1445_v41, %v874_v56 }
 0x3ef   :  { %v2010_v58 = vadd.f32 %v876_v53, %v875_v42 }
 0x3f1   :  { %v878_v5 = vpack.c.bf16 %v2010_v58, %v2010_v58 }
 0x3f3   :  { %887 = vmatmul.bf16.vlgmr.msra.gmra.mxu0 %v878_v5  ;;  %900 = vmatmul.bf16.vlgmr.msra.gmra.mxu1 %v878_v5 }
 0x3f4   :  { %913 = vmatmul.bf16.vlgmr.msra.gmra.mxu2 %v878_v5  ;;  %1079 = vmatpush.bf16.msra.mxu0 %v1721_v59 }
 0x3f8   :  { %1080 = vmatpush.bf16.msra.mxu0 %v1731_v4 }
 0x3fc   :  { %1081 = vmatpush.bf16.msra.mxu0 %v1738_v11 }
 0x400   :  { %1082 = vmatpush.bf16.msra.mxu0 %v1749_v22 }
 0x404   :  { %1083 = vmatpush.bf16.msra.mxu0 %v1759_v31 }
 0x408   :  { %1084 = vmatpush.bf16.msra.mxu0 %v1768_v40 }
 0x40c   :  { %1085 = vmatpush.bf16.msra.mxu0 %v1778_v52 }
 0x410   :  { %1086 = vmatpush.bf16.msra.mxu0 %v1791_v1 }
 0x470   :  { %v888_v9 = vpop.f32.mrf.mxu0  ;;  %v901_v55 = vpop.f32.mrf.mxu1 }
 0x471   :  { %v918_v54 = vadd.f32 %v888_v9, %v1879_v14  ;;  %v938_v59 = vadd.f32 %v901_v55, %v1881_v15 }
 0x473   :  { %v1341_v27 = vmul.f32 -1.442695, %v918_v54  ;;  %v1342_v4 = vmul.f32 -1.442695, %v938_v59 }
 0x475   :  { %1446 = vpow2.f32 %v1341_v27 }
 0x476   :  { %1448 = vpow2.f32 %v1342_v4 }
 0x477   :  { %v914_v11 = vpop.f32.mrf.mxu2 }
 0x478   :  { %v890_v22 = vpop.f32.mrf.mxu0  ;;  %v903_v44 = vpop.f32.mrf.mxu1 }
 0x47b   :  { %v1447_v31 = vpop.eup %1446 }
 0x47c   :  { %v1449_v46 = vpop.eup %1448  ;;  %v922_v40 = vadd.f32 1.0, %v1447_v31 }
 0x47d   :  { %v942_v61 = vadd.f32 1.0, %v1449_v46 }
 0x47e   :  { %1450 = vrcp.f32 %v922_v40  ;;  %v934_v17 = vand.u32 2147483648, %v922_v40  ;;  %v932_v26 = vand.u32 2147483647, %v922_v40  ;;  %vm928_vm8 = vweird.f32 %v922_v40 }
 0x47f   :  { %1452 = vrcp.f32 %v942_v61  ;;  %v916_v52 = vpop.f32.mrf.mxu2  ;;  %v954_v63 = vand.u32 2147483648, %v942_v61  ;;  %vm948_vm12 = vweird.f32 %v942_v61  ;;  %v952_v3 = vand.u32 2147483647, %v942_v61 }
 0x480   :  { %v935_v39 = vor.u32 1.1754944e-38, %v934_v17  ;;  %vm933_vm10 = vcmp.eq.f32.partialorder %v932_v26, 8.507059e+37 }
 0x481   :  { %v955_v12 = vor.u32 1.1754944e-38, %v954_v63  ;;  %vm953_vm14 = vcmp.eq.f32.partialorder %v952_v3, 8.507059e+37 }
 0x484   :  { %v1451_v1 = vpop.eup %1450 }
 0x485   :  { %v1453_v0 = vpop.eup %1452  ;;  %v924_v7 = vmul.f32 %v1451_v1, %v922_v40  ;;  %vm929_vm7 = vweird.f32 %v1451_v1 }
 0x486   :  { %v944_v14 = vmul.f32 %v1453_v0, %v942_v61  ;;  %vm930_vm9 = vmor %vm928_vm8, %vm929_vm7  ;;  %vm949_vm11 = vweird.f32 %v1453_v0 }
 0x487   :  { %v925_v13 = vsub.f32 1.0, %v924_v7  ;;  %vm950_vm13 = vmor %vm948_vm12, %vm949_vm11 }
 0x488   :  { %v945_v15 = vsub.f32 1.0, %v944_v14 }
 0x489   :  { %v926_v21 = vmul.f32 %v1451_v1, %v925_v13 }
 0x48a   :  { %v946_v30 = vmul.f32 %v1453_v0, %v945_v15 }
 0x48b   :  { %v927_v35 = vadd.f32 %v1451_v1, %v926_v21 }
 0x48c   :  { %v947_v60 = vadd.f32 %v1453_v0, %v946_v30 }
 0x48d   :  { %v931_v49 = vsel %vm930_vm9, %v1451_v1, %v927_v35 }
 0x48e   :  { %v936_v51 = vsel %vm933_vm10, %v935_v39, %v931_v49  ;;  %v951_v34 = vsel %vm950_vm13, %v1453_v0, %v947_v60 }
 0x48f   :  { %v958_v6 = vmul.f32 %v936_v51, %v914_v11  ;;  %v956_v47 = vsel %vm953_vm14, %v955_v12, %v951_v34 }
 0x490   :  { %v961_v50 = vsub.f32 1.0, %v956_v47  ;;  %v963_v43 = vmul.f32 %v956_v47, %v2010_v58 }
 0x491   :  { %v959_v25 = vadd.f32 %v958_v6, %v1930_v10 }
 0x493   :  { %1454 = vtanh.f32 %v959_v25 }
 0x499   :  { %v1455_v62 = vpop.eup %1454 }
 0x49a   :  { %v962_v28 = vmul.f32 %v1455_v62, %v961_v50 }
 0x49c   :  { %v964_v8 = vadd.f32 %v963_v43, %v962_v28 }
 0x49e   :  { %v965_v2 = vpack.c.bf16 %v964_v8, %v964_v8 }
 0x4a0   :  { %974 = vmatmul.bf16.vlgmr.msra.gmra.mxu3 %v965_v2  ;;  %987 = vmatmul.bf16.vlgmr.msrb.gmra.mxu0 %v965_v2 }
 0x4a1   :  { %1000 = vmatmul.bf16.vlgmr.msrb.gmra.mxu1 %v965_v2 }
 0x51d   :  { %v988_v57 = vpop.f32.mrf.mxu0 }
 0x51e   :  { %v1025_v32 = vadd.f32 %v988_v57, %v1885_v18  ;;  %v1001_v29 = vpop.f32.mrf.mxu1 }
 0x520   :  { %v1344_v10 = vmul.f32 -1.442695, %v1025_v32 }
 0x522   :  { %1456 = vpow2.f32 %v1344_v10 }
 0x523   :  { %v975_v33 = vpop.f32.mrf.mxu3 }
 0x524   :  { %v1005_v36 = vadd.f32 %v975_v33, %v1883_v16 }
 0x525   :  { %v990_v37 = vpop.f32.mrf.mxu0 }
 0x526   :  { %v1343_v38 = vmul.f32 -1.442695, %v1005_v36  ;;  %v1003_v48 = vpop.f32.mrf.mxu1 }
 0x528   :  { %v1457_v56 = vpop.eup %1456  ;;  %1458 = vpow2.f32 %v1343_v38 }
 0x529   :  { %v1029_v41 = vadd.f32 1.0, %v1457_v56 }
 0x52b   :  { %v977_v42 = vpop.f32.mrf.mxu3  ;;  %1460 = vrcp.f32 %v1029_v41  ;;  %v1041_v61 = vand.u32 2147483648, %v1029_v41  ;;  %vm1035_vm5 = vweird.f32 %v1029_v41  ;;  %v1039_v1 = vand.u32 2147483647, %v1029_v41 }
 0x52d   :  { %v1042_v14 = vor.u32 1.1754944e-38, %v1041_v61  ;;  %vm1040_vm7 = vcmp.eq.f32.partialorder %v1039_v1, 8.507059e+37 }
 0x52e   :  { %v1459_v53 = vpop.eup %1458 }
 0x52f   :  { %v1009_v58 = vadd.f32 1.0, %v1459_v53 }
 0x531   :  { %1462 = vrcp.f32 %v1009_v58  ;;  %v1461_v5 = vpop.eup %1460  ;;  %v1021_v27 = vand.u32 2147483648, %v1009_v58  ;;  %v1019_v16 = vand.u32 2147483647, %v1009_v58  ;;  %vm1015_vm0 = vweird.f32 %v1009_v58 }
 0x532   :  { %v1031_v9 = vmul.f32 %v1461_v5, %v1029_v41  ;;  %vm1036_vm4 = vweird.f32 %v1461_v5 }
 0x533   :  { %v1022_v44 = vor.u32 1.1754944e-38, %v1021_v27  ;;  %vm1020_vm2 = vcmp.eq.f32.partialorder %v1019_v16, 8.507059e+37  ;;  %vm1037_vm6 = vmor %vm1035_vm5, %vm1036_vm4 }
 0x534   :  { %v1032_v54 = vsub.f32 1.0, %v1031_v9 }
 0x536   :  { %v1033_v11 = vmul.f32 %v1461_v5, %v1032_v54 }
 0x537   :  { %v1463_v18 = vpop.eup %1462 }
 0x538   :  { %v1011_v55 = vmul.f32 %v1463_v18, %v1009_v58  ;;  %vm1016_vm15 = vweird.f32 %v1463_v18  ;;  %v1034_v40 = vadd.f32 %v1461_v5, %v1033_v11 }
 0x539   :  { %vm1017_vm1 = vmor %vm1015_vm0, %vm1016_vm15  ;;  %vm1146_vm0 = vcmask 1041408  }
 0x53a   :  { %v1012_v59 = vsub.f32 1.0, %v1011_v55  ;;  %v1038_v7 = vsel %vm1037_vm6, %v1461_v5, %v1034_v40 }
 0x53b   :  { %v1043_v13 = vsel %vm1040_vm7, %v1042_v14, %v1038_v7 }
 0x53c   :  { %v1013_v4 = vmul.f32 %v1463_v18, %v1012_v59  ;;  %v1048_v15 = vsub.f32 1.0, %v1043_v13  ;;  %v1050_v26 = vmul.f32 %v1043_v13, %v964_v8 }
 0x53e   :  { %v1014_v22 = vadd.f32 %v1463_v18, %v1013_v4 }
 0x540   :  { %v1018_v31 = vsel %vm1017_vm1, %v1463_v18, %v1014_v22  ;;  %vm1149_vm1 = vcmask 257026  }
 0x541   :  { %v1023_v46 = vsel %vm1020_vm2, %v1022_v44, %v1018_v31  ;;  %vm1150_vm2 = vmor %vm1149_vm1, %vm1146_vm0 }
 0x542   :  { %v1045_v52 = vmul.f32 %v1023_v46, %v1001_v29 }
 0x544   :  { %v1046_v0 = vadd.f32 %v1045_v52, %v1932_v23 }
 0x546   :  { %1464 = vtanh.f32 %v1046_v0 }
 0x54c   :  { %v1465_v17 = vpop.eup %1464 }
 0x54d   :  { %v1049_v21 = vmul.f32 %v1465_v17, %v1048_v15 }
 0x54f   :  { %v2029_v30 = vadd.f32 %v1050_v26, %v1049_v21 }
 0x551   :  { %v1052_v35 = vpack.c.bf16 %v2029_v30, %v2029_v30 }
 0x553   :  { %1061 = vmatmul.bf16.vlgmr.msrb.gmra.mxu2 %v1052_v35  ;;  %1074 = vmatmul.bf16.vlgmr.msrb.gmra.mxu3 %v1052_v35 }
 0x554   :  { %1087 = vmatmul.bf16.vlgmr.msra.gmra.mxu0 %v1052_v35 }
 0x5d1   :  { %v1088_v39 = vpop.f32.mrf.mxu0 }
 0x5d6   :  { %v1062_v49 = vpop.f32.mrf.mxu2  ;;  %v1075_v23 = vpop.f32.mrf.mxu3 }
 0x5d7   :  { %v1092_v51 = vadd.f32 %v1062_v49, %v1887_v19  ;;  %v1112_v60 = vadd.f32 %v1075_v23, %v1889_v20 }
 0x5d9   :  { %v1345_v63 = vmul.f32 -1.442695, %v1092_v51  ;;  %v1346_v6 = vmul.f32 -1.442695, %v1112_v60  ;;  %v1090_v3 = vpop.f32.mrf.mxu0 }
 0x5db   :  { %1466 = vpow2.f32 %v1345_v63 }
 0x5dc   :  { %1468 = vpow2.f32 %v1346_v6 }
 0x5de   :  { %v1064_v25 = vpop.f32.mrf.mxu2  ;;  %v1077_v34 = vpop.f32.mrf.mxu3 }
 0x5e1   :  { %v1467_v12 = vpop.eup %1466 }
 0x5e2   :  { %v1469_v47 = vpop.eup %1468  ;;  %v1096_v50 = vadd.f32 1.0, %v1467_v12 }
 0x5e3   :  { %v1116_v62 = vadd.f32 1.0, %v1469_v47 }
 0x5e4   :  { %1470 = vrcp.f32 %v1096_v50  ;;  %v1108_v57 = vand.u32 2147483648, %v1096_v50  ;;  %v1106_v29 = vand.u32 2147483647, %v1096_v50  ;;  %vm1102_vm9 = vweird.f32 %v1096_v50 }
 0x5e5   :  { %1472 = vrcp.f32 %v1116_v62  ;;  %v1128_v56 = vand.u32 2147483648, %v1116_v62  ;;  %vm1122_vm13 = vweird.f32 %v1116_v62  ;;  %v1126_v42 = vand.u32 2147483647, %v1116_v62 }
 0x5e6   :  { %v1109_v36 = vor.u32 1.1754944e-38, %v1108_v57  ;;  %vm1107_vm11 = vcmp.eq.f32.partialorder %v1106_v29, 8.507059e+37 }
 0x5e7   :  { %v1129_v5 = vor.u32 1.1754944e-38, %v1128_v56  ;;  %vm1127_vm15 = vcmp.eq.f32.partialorder %v1126_v42, 8.507059e+37 }
 0x5ea   :  { %v1471_v28 = vpop.eup %1470 }
 0x5eb   :  { %v1473_v43 = vpop.eup %1472  ;;  %v1098_v8 = vmul.f32 %v1471_v28, %v1096_v50  ;;  %vm1103_vm8 = vweird.f32 %v1471_v28 }
 0x5ec   :  { %v1118_v2 = vmul.f32 %v1473_v43, %v1116_v62  ;;  %vm1104_vm10 = vmor %vm1102_vm9, %vm1103_vm8  ;;  %vm1123_vm12 = vweird.f32 %v1473_v43 }
 0x5ed   :  { %v1099_v19 = vsub.f32 1.0, %v1098_v8  ;;  %vm1124_vm14 = vmor %vm1122_vm13, %vm1123_vm12 }
 0x5ee   :  { %v1119_v20 = vsub.f32 1.0, %v1118_v2 }
 0x5ef   :  { %v1100_v32 = vmul.f32 %v1471_v28, %v1099_v19 }
 0x5f0   :  { %v1120_v10 = vmul.f32 %v1473_v43, %v1119_v20 }
 0x5f1   :  { %v1101_v33 = vadd.f32 %v1471_v28, %v1100_v32 }
 0x5f2   :  { %v1121_v48 = vadd.f32 %v1473_v43, %v1120_v10 }
 0x5f3   :  { %v1105_v37 = vsel %vm1104_vm10, %v1471_v28, %v1101_v33 }
 0x5f4   :  { %v1110_v38 = vsel %vm1107_vm11, %v1109_v36, %v1105_v37  ;;  %v1125_v58 = vsel %vm1124_vm14, %v1473_v43, %v1121_v48 }
 0x5f5   :  { %v1132_v41 = vmul.f32 %v1110_v38, %v1088_v39  ;;  %v1130_v9 = vsel %vm1127_vm15, %v1129_v5, %v1125_v58 }
 0x5f6   :  { %v1135_v18 = vsub.f32 1.0, %v1130_v9  ;;  %v1137_v59 = vmul.f32 %v1130_v9, %v2029_v30 }
 0x5f7   :  { %v1133_v53 = vadd.f32 %v1132_v41, %v1934_v24 }
 0x5f9   :  { %1474 = vtanh.f32 %v1133_v53 }
 0x5ff   :  { %v1475_v55 = vpop.eup %1474 }
 0x600   :  { %v1136_v54 = vmul.f32 %v1475_v55, %v1135_v18 }
 0x602   :  { %v1138_v24 = vadd.f32 %v1137_v59, %v1136_v54 }
 0x604   :  { %1140 = vrot.lane.b32.xlu0 %v1138_v24, %s1585_s23 }
 0x676   :  { %v1141_v27 = vpop.permute.xlu0 %1140 }
 0x677   :  { %v1143_v4 = vsel %vm67_vm3, %v1969_v45, %v1141_v27  ;;  %v1145_v16 = vrot.slane %v1141_v27, 6 }
 0x679   :  { %v1147_v11 = vsel %vm1146_vm0, %v1143_v4, %v1145_v16 }
 0x67a   :  { %1151 = vst.msk [vmem:[#allocation7] sm:$0xf] %vm1150_vm2, %v1147_v11 }
 0x67b   :  { %1162 = dma.vmem_to_hbm [thread:$0]  %s1158_s13, 64, %s1160_s16, [#allocation4]  }
 0x67c   :  { %1576 = dma.done.wait [#allocation4], 64  }
 0x67d   :  { %1577 = vsyncadd [#allocation4], 4294967232 }
 0x67e   :  { %1578 = dma.done.wait [#allocation9], 32  }
 0x67f   :  { %1579 = vsyncadd [#allocation9], 4294967264 }
 0x680   :  { %1182 = vsyncpa [#allocation3], 1 }
 0x681   :  { %1183 = vsyncpa [#allocation6], 1 }
 0x682   :  { %1184 = vsyncpa [#allocation4], 1 }
 0x683   :  { %1185 = vsyncpa [#allocation9], 1 }

</bundles_post_ra>
